<compile_context>
chip_gen: v7x
topology: tpu7x:2x2x1
jax: 0.10.0
libtpu: 0.0.40
codegen_flags: <defaults>
</compile_context>

<pallas_src>
import math

import jax
import jax.numpy as jnp
import numpy as np
from jax.experimental import pallas as pl
from jax.experimental.pallas import tpu as pltpu


def _rnn_kernel(x_ref, wih_ref, whh_ref, b_ref, wout_ref, bout_ref,
                pred_ref, idx_ref):
    """Full LSTM recurrence + ReLU + linear head, all resident in VMEM.

    x_ref    : (seq, D)        f32
    wih_ref  : (D, 4H)         f32   (transposed weight_ih_l0)
    whh_ref  : (H, 4H)         f32   (transposed weight_hh_l0)
    b_ref    : (1, 4H)         f32   (b_ih + b_hh, folded once)
    wout_ref : (H, out_dim)    f32   (transposed out.weight)
    bout_ref : (1, out_dim)    f32
    pred_ref : (2, out_dim)    f32   == prediction.squeeze() in torch
    idx_ref  : (1, out_dim)    i32   == torch.max(prediction, 0).indices
    """
    seq_len = x_ref.shape[0]
    H = whh_ref.shape[0]

    # Hoisted input projection + bias: one well-shaped (seq, D) @ (D, 4H)
    # matmul instead of `seq` tiny matmuls on the recurrence critical path.
    gates_x = (jnp.dot(x_ref[...], wih_ref[...],
                       preferred_element_type=jnp.float32)
               + b_ref[...])                                      # (seq, 4H)

    h = jnp.zeros((1, H), jnp.float32)
    c = jnp.zeros((1, H), jnp.float32)

    # seq_len is static and tiny -> fully unrolled straight-line recurrence
    # (static gates_x row slices, only the h-matmul stays on the serial chain).
    for t in range(seq_len):
        gates = gates_x[t:t + 1, :] + jnp.dot(
            h, whh_ref[...], preferred_element_type=jnp.float32)  # (1, 4H)
        # PyTorch LSTM gate order: i, f, g, o.  With H a multiple of 128 every
        # slice below is a whole-vreg lane-aligned slice (no XLU shuffles).
        i_g = jax.nn.sigmoid(gates[:, 0 * H:1 * H])
        f_g = jax.nn.sigmoid(gates[:, 1 * H:2 * H])
        g_g = jnp.tanh(gates[:, 2 * H:3 * H])
        o_g = jax.nn.sigmoid(gates[:, 3 * H:4 * H])
        c = f_g * c + i_g * g_g
        h = o_g * jnp.tanh(c)

    # torch.cat([h_n, c_n], dim=1) on (1,1,H) tensors -> (1,2,H); after the
    # later .squeeze() this is exactly the (2, H) stack [h_n; c_n].
    hc = jnp.concatenate([h, c], axis=0)                          # (2, H)
    hc = jnp.maximum(hc, 0.0)                                     # ReLU
    pred = (jnp.dot(hc, wout_ref[...],
                    preferred_element_type=jnp.float32)
            + bout_ref[...])                                      # (2, out_dim)
    pred_ref[...] = pred

    # torch.max(prediction, 0): first-occurrence argmax over the 2 rows.
    # With 2 rows this is exactly "row 1 strictly greater than row 0".
    idx_ref[...] = jnp.where(pred[1:2, :] > pred[0:1, :], 1, 0).astype(jnp.int32)


def prepare_params(w_ih, w_hh, b_ih, b_hh, w_out, b_out):
    """One-time packing (transpose / cast / bias fold) — keep OUT of the per-call path.

    PyTorch shapes in: w_ih (4H, D), w_hh (4H, H), b_ih/b_hh (4H,),
                       w_out (out_dim, H), b_out (out_dim,).
    """
    return (jnp.transpose(w_ih).astype(jnp.float32),              # (D, 4H)
            jnp.transpose(w_hh).astype(jnp.float32),              # (H, 4H)
            (b_ih + b_hh).astype(jnp.float32)[None, :],           # (1, 4H)
            jnp.transpose(w_out).astype(jnp.float32),              # (H, out_dim)
            b_out.astype(jnp.float32)[None, :])                    # (1, out_dim)


@jax.jit
def rnn_forward(x, wih_t, whh_t, b, wout_t, bout):
    """Mirrors RNN.forward on pre-packed params.

    Returns (prediction (2, out_dim), argmax-over-dim0 indices (out_dim,)).
    """
    out_dim = wout_t.shape[1]
    vmem = pl.BlockSpec(memory_space=pltpu.MemorySpace.VMEM)
    pred, idx = pl.pallas_call(
        _rnn_kernel,
        out_shape=(jax.ShapeDtypeStruct((2, out_dim), jnp.float32),
                   jax.ShapeDtypeStruct((1, out_dim), jnp.int32)),
        in_specs=[vmem] * 6,
        out_specs=(vmem, vmem),
    )(x.astype(jnp.float32), wih_t, whh_t, b, wout_t, bout)

    # TODO(synk): the PyTorch module calls `idx.item()`, which is only valid for
    # a single-element result (out_dim=3 here); we return the full index vector.
    return pred, idx[0]


def _reference(x, w_ih, w_hh, b_ih, b_hh, w_out, b_out):
    """Pure-JAX reference of the PyTorch forward (for a correctness check)."""
    H = w_hh.shape[1]
    h = jnp.zeros((H,), jnp.float32)
    c = jnp.zeros((H,), jnp.float32)
    for t in range(x.shape[0]):
        g = w_ih @ x[t] + w_hh @ h + b_ih + b_hh
        i = jax.nn.sigmoid(g[0 * H:1 * H])
        f = jax.nn.sigmoid(g[1 * H:2 * H])
        gg = jnp.tanh(g[2 * H:3 * H])
        o = jax.nn.sigmoid(g[3 * H:4 * H])
        c = f * c + i * gg
        h = o * jnp.tanh(c)
    hc = jnp.maximum(jnp.stack([h, c], axis=0), 0.0)               # (2, H)
    pred = hc @ w_out.T + b_out                                    # (2, out_dim)
    return pred, jnp.argmax(pred, axis=0)


if __name__ == "__main__":
    # Module defaults: in_dim=174, hidden_dim=128, out_dim=3; short sequence.
    seq_len, in_dim, hidden_dim, out_dim = 8, 174, 128, 3

    key = jax.random.PRNGKey(0)
    ks = jax.random.split(key, 7)
    s = 1.0 / math.sqrt(hidden_dim)

    x = jax.random.normal(ks[0], (seq_len, in_dim), jnp.float32)

    # Deterministic synthetic parameters with PyTorch nn.LSTM / nn.Linear shapes.
    w_ih = jax.random.uniform(ks[1], (4 * hidden_dim, in_dim), jnp.float32, -s, s)
    w_hh = jax.random.uniform(ks[2], (4 * hidden_dim, hidden_dim), jnp.float32, -s, s)
    b_ih = jax.random.uniform(ks[3], (4 * hidden_dim,), jnp.float32, -s, s)
    b_hh = jax.random.uniform(ks[4], (4 * hidden_dim,), jnp.float32, -s, s)
    w_out = jax.random.uniform(ks[5], (out_dim, hidden_dim), jnp.float32, -s, s)
    b_out = jax.random.uniform(ks[6], (out_dim,), jnp.float32, -s, s)

    # One-time parameter packing (kept out of the per-call path).
    params = prepare_params(w_ih, w_hh, b_ih, b_hh, w_out, b_out)

    pred, idx = rnn_forward(x, *params)
    jax.block_until_ready((pred, idx))
    assert pred.shape == (2, out_dim) and idx.shape == (out_dim,)

    # Correctness check against a pure-JAX reference of the same forward.
    pred_ref, idx_ref = _reference(x, w_ih, w_hh, b_ih, b_hh, w_out, b_out)
    np.testing.assert_allclose(np.asarray(pred), np.asarray(pred_ref),
                               rtol=1e-2, atol=1e-2)
    assert np.array_equal(np.asarray(idx), np.asarray(idx_ref))

    print("KERNEL_OK")
</pallas_src>

<mosaic_0001>
module attributes {stable_mosaic.version = 11 : i64} {
  func.func @_rnn_kernel(%arg0: memref<8x174xf32, #tpu.memory_space<vmem>>, %arg1: memref<174x512xf32, #tpu.memory_space<vmem>>, %arg2: memref<128x512xf32, #tpu.memory_space<vmem>>, %arg3: memref<1x512xf32, #tpu.memory_space<vmem>>, %arg4: memref<128x3xf32, #tpu.memory_space<vmem>>, %arg5: memref<1x3xf32, #tpu.memory_space<vmem>>, %arg6: memref<2x3xf32, #tpu.memory_space<vmem>>, %arg7: memref<1x3xi32, #tpu.memory_space<vmem>>) attributes {dimension_semantics = [], scalar_prefetch = 0 : i64, scratch_operands = 0 : i64, tpu.core_type = #tpu.core_type<tc>} {
    %c0 = arith.constant 0 : index
    %c0_0 = arith.constant 0 : index
    %0 = vector.load %arg0[%c0, %c0_0] : memref<8x174xf32, #tpu.memory_space<vmem>>, vector<8x174xf32>
    %c0_1 = arith.constant 0 : index
    %c0_2 = arith.constant 0 : index
    %1 = vector.load %arg1[%c0_1, %c0_2] : memref<174x512xf32, #tpu.memory_space<vmem>>, vector<174x512xf32>
    %cst = arith.constant dense<0.000000e+00> : vector<8x512xf32>
    %2 = tpu.matmul %0, %1, %cst {dimension_numbers = #tpu.dot_dimension_numbers<[1], [0], [0], [1], [0, 0, 1, 1], [], []>} : vector<8x174xf32>, vector<174x512xf32>, vector<8x512xf32> -> vector<8x512xf32>
    %c0_3 = arith.constant 0 : index
    %c0_4 = arith.constant 0 : index
    %3 = vector.load %arg3[%c0_3, %c0_4] : memref<1x512xf32, #tpu.memory_space<vmem>>, vector<1x512xf32>
    %4 = vector.broadcast %3 : vector<1x512xf32> to vector<8x512xf32>
    %5 = arith.addf %2, %4 : vector<8x512xf32>
    %cst_5 = arith.constant 0.000000e+00 : f32
    %6 = vector.broadcast %cst_5 : f32 to vector<1x128xf32>
    %cst_6 = arith.constant 0.000000e+00 : f32
    %7 = vector.broadcast %cst_6 : f32 to vector<1x128xf32>
    %8 = vector.extract_strided_slice %5 {offsets = [0, 0], sizes = [1, 512], strides = [1, 1]} : vector<8x512xf32> to vector<1x512xf32>
    %c0_7 = arith.constant 0 : index
    %c0_8 = arith.constant 0 : index
    %9 = vector.load %arg2[%c0_7, %c0_8] : memref<128x512xf32, #tpu.memory_space<vmem>>, vector<128x512xf32>
    %cst_9 = arith.constant dense<0.000000e+00> : vector<1x512xf32>
    %10 = tpu.matmul %6, %9, %cst_9 {dimension_numbers = #tpu.dot_dimension_numbers<[1], [0], [0], [1], [0, 0, 1, 1], [], []>} : vector<1x128xf32>, vector<128x512xf32>, vector<1x512xf32> -> vector<1x512xf32>
    %11 = arith.addf %8, %10 : vector<1x512xf32>
    %12 = vector.extract_strided_slice %11 {offsets = [0, 0], sizes = [1, 128], strides = [1, 1]} : vector<1x512xf32> to vector<1x128xf32>
    %13 = arith.negf %12 : vector<1x128xf32>
    %14 = math.exp %13 : vector<1x128xf32>
    %cst_10 = arith.constant 1.000000e+00 : f32
    %15 = vector.broadcast %cst_10 : f32 to vector<1x128xf32>
    %16 = arith.addf %15, %14 : vector<1x128xf32>
    %17 = arith.divf %15, %16 : vector<1x128xf32>
    %18 = vector.extract_strided_slice %11 {offsets = [0, 128], sizes = [1, 128], strides = [1, 1]} : vector<1x512xf32> to vector<1x128xf32>
    %19 = arith.negf %18 : vector<1x128xf32>
    %20 = math.exp %19 : vector<1x128xf32>
    %cst_11 = arith.constant 1.000000e+00 : f32
    %21 = vector.broadcast %cst_11 : f32 to vector<1x128xf32>
    %22 = arith.addf %21, %20 : vector<1x128xf32>
    %23 = arith.divf %21, %22 : vector<1x128xf32>
    %24 = vector.extract_strided_slice %11 {offsets = [0, 256], sizes = [1, 128], strides = [1, 1]} : vector<1x512xf32> to vector<1x128xf32>
    %25 = math.tanh %24 : vector<1x128xf32>
    %26 = vector.extract_strided_slice %11 {offsets = [0, 384], sizes = [1, 128], strides = [1, 1]} : vector<1x512xf32> to vector<1x128xf32>
    %27 = arith.negf %26 : vector<1x128xf32>
    %28 = math.exp %27 : vector<1x128xf32>
    %cst_12 = arith.constant 1.000000e+00 : f32
    %29 = vector.broadcast %cst_12 : f32 to vector<1x128xf32>
    %30 = arith.addf %29, %28 : vector<1x128xf32>
    %31 = arith.divf %29, %30 : vector<1x128xf32>
    %32 = arith.mulf %23, %7 : vector<1x128xf32>
    %33 = arith.mulf %17, %25 : vector<1x128xf32>
    %34 = arith.addf %32, %33 : vector<1x128xf32>
    %35 = math.tanh %34 : vector<1x128xf32>
    %36 = arith.mulf %31, %35 : vector<1x128xf32>
    %37 = vector.extract_strided_slice %5 {offsets = [1, 0], sizes = [1, 512], strides = [1, 1]} : vector<8x512xf32> to vector<1x512xf32>
    %c0_13 = arith.constant 0 : index
    %c0_14 = arith.constant 0 : index
    %38 = vector.load %arg2[%c0_13, %c0_14] : memref<128x512xf32, #tpu.memory_space<vmem>>, vector<128x512xf32>
    %cst_15 = arith.constant dense<0.000000e+00> : vector<1x512xf32>
    %39 = tpu.matmul %36, %38, %cst_15 {dimension_numbers = #tpu.dot_dimension_numbers<[1], [0], [0], [1], [0, 0, 1, 1], [], []>} : vector<1x128xf32>, vector<128x512xf32>, vector<1x512xf32> -> vector<1x512xf32>
    %40 = arith.addf %37, %39 : vector<1x512xf32>
    %41 = vector.extract_strided_slice %40 {offsets = [0, 0], sizes = [1, 128], strides = [1, 1]} : vector<1x512xf32> to vector<1x128xf32>
    %42 = arith.negf %41 : vector<1x128xf32>
    %43 = math.exp %42 : vector<1x128xf32>
    %cst_16 = arith.constant 1.000000e+00 : f32
    %44 = vector.broadcast %cst_16 : f32 to vector<1x128xf32>
    %45 = arith.addf %44, %43 : vector<1x128xf32>
    %46 = arith.divf %44, %45 : vector<1x128xf32>
    %47 = vector.extract_strided_slice %40 {offsets = [0, 128], sizes = [1, 128], strides = [1, 1]} : vector<1x512xf32> to vector<1x128xf32>
    %48 = arith.negf %47 : vector<1x128xf32>
    %49 = math.exp %48 : vector<1x128xf32>
    %cst_17 = arith.constant 1.000000e+00 : f32
    %50 = vector.broadcast %cst_17 : f32 to vector<1x128xf32>
    %51 = arith.addf %50, %49 : vector<1x128xf32>
    %52 = arith.divf %50, %51 : vector<1x128xf32>
    %53 = vector.extract_strided_slice %40 {offsets = [0, 256], sizes = [1, 128], strides = [1, 1]} : vector<1x512xf32> to vector<1x128xf32>
    %54 = math.tanh %53 : vector<1x128xf32>
    %55 = vector.extract_strided_slice %40 {offsets = [0, 384], sizes = [1, 128], strides = [1, 1]} : vector<1x512xf32> to vector<1x128xf32>
    %56 = arith.negf %55 : vector<1x128xf32>
    %57 = math.exp %56 : vector<1x128xf32>
    %cst_18 = arith.constant 1.000000e+00 : f32
    %58 = vector.broadcast %cst_18 : f32 to vector<1x128xf32>
    %59 = arith.addf %58, %57 : vector<1x128xf32>
    %60 = arith.divf %58, %59 : vector<1x128xf32>
    %61 = arith.mulf %52, %34 : vector<1x128xf32>
    %62 = arith.mulf %46, %54 : vector<1x128xf32>
    %63 = arith.addf %61, %62 : vector<1x128xf32>
    %64 = math.tanh %63 : vector<1x128xf32>
    %65 = arith.mulf %60, %64 : vector<1x128xf32>
    %66 = vector.extract_strided_slice %5 {offsets = [2, 0], sizes = [1, 512], strides = [1, 1]} : vector<8x512xf32> to vector<1x512xf32>
    %c0_19 = arith.constant 0 : index
    %c0_20 = arith.constant 0 : index
    %67 = vector.load %arg2[%c0_19, %c0_20] : memref<128x512xf32, #tpu.memory_space<vmem>>, vector<128x512xf32>
    %cst_21 = arith.constant dense<0.000000e+00> : vector<1x512xf32>
    %68 = tpu.matmul %65, %67, %cst_21 {dimension_numbers = #tpu.dot_dimension_numbers<[1], [0], [0], [1], [0, 0, 1, 1], [], []>} : vector<1x128xf32>, vector<128x512xf32>, vector<1x512xf32> -> vector<1x512xf32>
    %69 = arith.addf %66, %68 : vector<1x512xf32>
    %70 = vector.extract_strided_slice %69 {offsets = [0, 0], sizes = [1, 128], strides = [1, 1]} : vector<1x512xf32> to vector<1x128xf32>
    %71 = arith.negf %70 : vector<1x128xf32>
    %72 = math.exp %71 : vector<1x128xf32>
    %cst_22 = arith.constant 1.000000e+00 : f32
    %73 = vector.broadcast %cst_22 : f32 to vector<1x128xf32>
    %74 = arith.addf %73, %72 : vector<1x128xf32>
    %75 = arith.divf %73, %74 : vector<1x128xf32>
    %76 = vector.extract_strided_slice %69 {offsets = [0, 128], sizes = [1, 128], strides = [1, 1]} : vector<1x512xf32> to vector<1x128xf32>
    %77 = arith.negf %76 : vector<1x128xf32>
    %78 = math.exp %77 : vector<1x128xf32>
    %cst_23 = arith.constant 1.000000e+00 : f32
    %79 = vector.broadcast %cst_23 : f32 to vector<1x128xf32>
    %80 = arith.addf %79, %78 : vector<1x128xf32>
    %81 = arith.divf %79, %80 : vector<1x128xf32>
    %82 = vector.extract_strided_slice %69 {offsets = [0, 256], sizes = [1, 128], strides = [1, 1]} : vector<1x512xf32> to vector<1x128xf32>
    %83 = math.tanh %82 : vector<1x128xf32>
    %84 = vector.extract_strided_slice %69 {offsets = [0, 384], sizes = [1, 128], strides = [1, 1]} : vector<1x512xf32> to vector<1x128xf32>
    %85 = arith.negf %84 : vector<1x128xf32>
    %86 = math.exp %85 : vector<1x128xf32>
    %cst_24 = arith.constant 1.000000e+00 : f32
    %87 = vector.broadcast %cst_24 : f32 to vector<1x128xf32>
    %88 = arith.addf %87, %86 : vector<1x128xf32>
    %89 = arith.divf %87, %88 : vector<1x128xf32>
    %90 = arith.mulf %81, %63 : vector<1x128xf32>
    %91 = arith.mulf %75, %83 : vector<1x128xf32>
    %92 = arith.addf %90, %91 : vector<1x128xf32>
    %93 = math.tanh %92 : vector<1x128xf32>
    %94 = arith.mulf %89, %93 : vector<1x128xf32>
    %95 = vector.extract_strided_slice %5 {offsets = [3, 0], sizes = [1, 512], strides = [1, 1]} : vector<8x512xf32> to vector<1x512xf32>
    %c0_25 = arith.constant 0 : index
    %c0_26 = arith.constant 0 : index
    %96 = vector.load %arg2[%c0_25, %c0_26] : memref<128x512xf32, #tpu.memory_space<vmem>>, vector<128x512xf32>
    %cst_27 = arith.constant dense<0.000000e+00> : vector<1x512xf32>
    %97 = tpu.matmul %94, %96, %cst_27 {dimension_numbers = #tpu.dot_dimension_numbers<[1], [0], [0], [1], [0, 0, 1, 1], [], []>} : vector<1x128xf32>, vector<128x512xf32>, vector<1x512xf32> -> vector<1x512xf32>
    %98 = arith.addf %95, %97 : vector<1x512xf32>
    %99 = vector.extract_strided_slice %98 {offsets = [0, 0], sizes = [1, 128], strides = [1, 1]} : vector<1x512xf32> to vector<1x128xf32>
    %100 = arith.negf %99 : vector<1x128xf32>
    %101 = math.exp %100 : vector<1x128xf32>
    %cst_28 = arith.constant 1.000000e+00 : f32
    %102 = vector.broadcast %cst_28 : f32 to vector<1x128xf32>
    %103 = arith.addf %102, %101 : vector<1x128xf32>
    %104 = arith.divf %102, %103 : vector<1x128xf32>
    %105 = vector.extract_strided_slice %98 {offsets = [0, 128], sizes = [1, 128], strides = [1, 1]} : vector<1x512xf32> to vector<1x128xf32>
    %106 = arith.negf %105 : vector<1x128xf32>
    %107 = math.exp %106 : vector<1x128xf32>
    %cst_29 = arith.constant 1.000000e+00 : f32
    %108 = vector.broadcast %cst_29 : f32 to vector<1x128xf32>
    %109 = arith.addf %108, %107 : vector<1x128xf32>
    %110 = arith.divf %108, %109 : vector<1x128xf32>
    %111 = vector.extract_strided_slice %98 {offsets = [0, 256], sizes = [1, 128], strides = [1, 1]} : vector<1x512xf32> to vector<1x128xf32>
    %112 = math.tanh %111 : vector<1x128xf32>
    %113 = vector.extract_strided_slice %98 {offsets = [0, 384], sizes = [1, 128], strides = [1, 1]} : vector<1x512xf32> to vector<1x128xf32>
    %114 = arith.negf %113 : vector<1x128xf32>
    %115 = math.exp %114 : vector<1x128xf32>
    %cst_30 = arith.constant 1.000000e+00 : f32
    %116 = vector.broadcast %cst_30 : f32 to vector<1x128xf32>
    %117 = arith.addf %116, %115 : vector<1x128xf32>
    %118 = arith.divf %116, %117 : vector<1x128xf32>
    %119 = arith.mulf %110, %92 : vector<1x128xf32>
    %120 = arith.mulf %104, %112 : vector<1x128xf32>
    %121 = arith.addf %119, %120 : vector<1x128xf32>
    %122 = math.tanh %121 : vector<1x128xf32>
    %123 = arith.mulf %118, %122 : vector<1x128xf32>
    %124 = vector.extract_strided_slice %5 {offsets = [4, 0], sizes = [1, 512], strides = [1, 1]} : vector<8x512xf32> to vector<1x512xf32>
    %c0_31 = arith.constant 0 : index
    %c0_32 = arith.constant 0 : index
    %125 = vector.load %arg2[%c0_31, %c0_32] : memref<128x512xf32, #tpu.memory_space<vmem>>, vector<128x512xf32>
    %cst_33 = arith.constant dense<0.000000e+00> : vector<1x512xf32>
    %126 = tpu.matmul %123, %125, %cst_33 {dimension_numbers = #tpu.dot_dimension_numbers<[1], [0], [0], [1], [0, 0, 1, 1], [], []>} : vector<1x128xf32>, vector<128x512xf32>, vector<1x512xf32> -> vector<1x512xf32>
    %127 = arith.addf %124, %126 : vector<1x512xf32>
    %128 = vector.extract_strided_slice %127 {offsets = [0, 0], sizes = [1, 128], strides = [1, 1]} : vector<1x512xf32> to vector<1x128xf32>
    %129 = arith.negf %128 : vector<1x128xf32>
    %130 = math.exp %129 : vector<1x128xf32>
    %cst_34 = arith.constant 1.000000e+00 : f32
    %131 = vector.broadcast %cst_34 : f32 to vector<1x128xf32>
    %132 = arith.addf %131, %130 : vector<1x128xf32>
    %133 = arith.divf %131, %132 : vector<1x128xf32>
    %134 = vector.extract_strided_slice %127 {offsets = [0, 128], sizes = [1, 128], strides = [1, 1]} : vector<1x512xf32> to vector<1x128xf32>
    %135 = arith.negf %134 : vector<1x128xf32>
    %136 = math.exp %135 : vector<1x128xf32>
    %cst_35 = arith.constant 1.000000e+00 : f32
    %137 = vector.broadcast %cst_35 : f32 to vector<1x128xf32>
    %138 = arith.addf %137, %136 : vector<1x128xf32>
    %139 = arith.divf %137, %138 : vector<1x128xf32>
    %140 = vector.extract_strided_slice %127 {offsets = [0, 256], sizes = [1, 128], strides = [1, 1]} : vector<1x512xf32> to vector<1x128xf32>
    %141 = math.tanh %140 : vector<1x128xf32>
    %142 = vector.extract_strided_slice %127 {offsets = [0, 384], sizes = [1, 128], strides = [1, 1]} : vector<1x512xf32> to vector<1x128xf32>
    %143 = arith.negf %142 : vector<1x128xf32>
    %144 = math.exp %143 : vector<1x128xf32>
    %cst_36 = arith.constant 1.000000e+00 : f32
    %145 = vector.broadcast %cst_36 : f32 to vector<1x128xf32>
    %146 = arith.addf %145, %144 : vector<1x128xf32>
    %147 = arith.divf %145, %146 : vector<1x128xf32>
    %148 = arith.mulf %139, %121 : vector<1x128xf32>
    %149 = arith.mulf %133, %141 : vector<1x128xf32>
    %150 = arith.addf %148, %149 : vector<1x128xf32>
    %151 = math.tanh %150 : vector<1x128xf32>
    %152 = arith.mulf %147, %151 : vector<1x128xf32>
    %153 = vector.extract_strided_slice %5 {offsets = [5, 0], sizes = [1, 512], strides = [1, 1]} : vector<8x512xf32> to vector<1x512xf32>
    %c0_37 = arith.constant 0 : index
    %c0_38 = arith.constant 0 : index
    %154 = vector.load %arg2[%c0_37, %c0_38] : memref<128x512xf32, #tpu.memory_space<vmem>>, vector<128x512xf32>
    %cst_39 = arith.constant dense<0.000000e+00> : vector<1x512xf32>
    %155 = tpu.matmul %152, %154, %cst_39 {dimension_numbers = #tpu.dot_dimension_numbers<[1], [0], [0], [1], [0, 0, 1, 1], [], []>} : vector<1x128xf32>, vector<128x512xf32>, vector<1x512xf32> -> vector<1x512xf32>
    %156 = arith.addf %153, %155 : vector<1x512xf32>
    %157 = vector.extract_strided_slice %156 {offsets = [0, 0], sizes = [1, 128], strides = [1, 1]} : vector<1x512xf32> to vector<1x128xf32>
    %158 = arith.negf %157 : vector<1x128xf32>
    %159 = math.exp %158 : vector<1x128xf32>
    %cst_40 = arith.constant 1.000000e+00 : f32
    %160 = vector.broadcast %cst_40 : f32 to vector<1x128xf32>
    %161 = arith.addf %160, %159 : vector<1x128xf32>
    %162 = arith.divf %160, %161 : vector<1x128xf32>
    %163 = vector.extract_strided_slice %156 {offsets = [0, 128], sizes = [1, 128], strides = [1, 1]} : vector<1x512xf32> to vector<1x128xf32>
    %164 = arith.negf %163 : vector<1x128xf32>
    %165 = math.exp %164 : vector<1x128xf32>
    %cst_41 = arith.constant 1.000000e+00 : f32
    %166 = vector.broadcast %cst_41 : f32 to vector<1x128xf32>
    %167 = arith.addf %166, %165 : vector<1x128xf32>
    %168 = arith.divf %166, %167 : vector<1x128xf32>
    %169 = vector.extract_strided_slice %156 {offsets = [0, 256], sizes = [1, 128], strides = [1, 1]} : vector<1x512xf32> to vector<1x128xf32>
    %170 = math.tanh %169 : vector<1x128xf32>
    %171 = vector.extract_strided_slice %156 {offsets = [0, 384], sizes = [1, 128], strides = [1, 1]} : vector<1x512xf32> to vector<1x128xf32>
    %172 = arith.negf %171 : vector<1x128xf32>
    %173 = math.exp %172 : vector<1x128xf32>
    %cst_42 = arith.constant 1.000000e+00 : f32
    %174 = vector.broadcast %cst_42 : f32 to vector<1x128xf32>
    %175 = arith.addf %174, %173 : vector<1x128xf32>
    %176 = arith.divf %174, %175 : vector<1x128xf32>
    %177 = arith.mulf %168, %150 : vector<1x128xf32>
    %178 = arith.mulf %162, %170 : vector<1x128xf32>
    %179 = arith.addf %177, %178 : vector<1x128xf32>
    %180 = math.tanh %179 : vector<1x128xf32>
    %181 = arith.mulf %176, %180 : vector<1x128xf32>
    %182 = vector.extract_strided_slice %5 {offsets = [6, 0], sizes = [1, 512], strides = [1, 1]} : vector<8x512xf32> to vector<1x512xf32>
    %c0_43 = arith.constant 0 : index
    %c0_44 = arith.constant 0 : index
    %183 = vector.load %arg2[%c0_43, %c0_44] : memref<128x512xf32, #tpu.memory_space<vmem>>, vector<128x512xf32>
    %cst_45 = arith.constant dense<0.000000e+00> : vector<1x512xf32>
    %184 = tpu.matmul %181, %183, %cst_45 {dimension_numbers = #tpu.dot_dimension_numbers<[1], [0], [0], [1], [0, 0, 1, 1], [], []>} : vector<1x128xf32>, vector<128x512xf32>, vector<1x512xf32> -> vector<1x512xf32>
    %185 = arith.addf %182, %184 : vector<1x512xf32>
    %186 = vector.extract_strided_slice %185 {offsets = [0, 0], sizes = [1, 128], strides = [1, 1]} : vector<1x512xf32> to vector<1x128xf32>
    %187 = arith.negf %186 : vector<1x128xf32>
    %188 = math.exp %187 : vector<1x128xf32>
    %cst_46 = arith.constant 1.000000e+00 : f32
    %189 = vector.broadcast %cst_46 : f32 to vector<1x128xf32>
    %190 = arith.addf %189, %188 : vector<1x128xf32>
    %191 = arith.divf %189, %190 : vector<1x128xf32>
    %192 = vector.extract_strided_slice %185 {offsets = [0, 128], sizes = [1, 128], strides = [1, 1]} : vector<1x512xf32> to vector<1x128xf32>
    %193 = arith.negf %192 : vector<1x128xf32>
    %194 = math.exp %193 : vector<1x128xf32>
    %cst_47 = arith.constant 1.000000e+00 : f32
    %195 = vector.broadcast %cst_47 : f32 to vector<1x128xf32>
    %196 = arith.addf %195, %194 : vector<1x128xf32>
    %197 = arith.divf %195, %196 : vector<1x128xf32>
    %198 = vector.extract_strided_slice %185 {offsets = [0, 256], sizes = [1, 128], strides = [1, 1]} : vector<1x512xf32> to vector<1x128xf32>
    %199 = math.tanh %198 : vector<1x128xf32>
    %200 = vector.extract_strided_slice %185 {offsets = [0, 384], sizes = [1, 128], strides = [1, 1]} : vector<1x512xf32> to vector<1x128xf32>
    %201 = arith.negf %200 : vector<1x128xf32>
    %202 = math.exp %201 : vector<1x128xf32>
    %cst_48 = arith.constant 1.000000e+00 : f32
    %203 = vector.broadcast %cst_48 : f32 to vector<1x128xf32>
    %204 = arith.addf %203, %202 : vector<1x128xf32>
    %205 = arith.divf %203, %204 : vector<1x128xf32>
    %206 = arith.mulf %197, %179 : vector<1x128xf32>
    %207 = arith.mulf %191, %199 : vector<1x128xf32>
    %208 = arith.addf %206, %207 : vector<1x128xf32>
    %209 = math.tanh %208 : vector<1x128xf32>
    %210 = arith.mulf %205, %209 : vector<1x128xf32>
    %211 = vector.extract_strided_slice %5 {offsets = [7, 0], sizes = [1, 512], strides = [1, 1]} : vector<8x512xf32> to vector<1x512xf32>
    %c0_49 = arith.constant 0 : index
    %c0_50 = arith.constant 0 : index
    %212 = vector.load %arg2[%c0_49, %c0_50] : memref<128x512xf32, #tpu.memory_space<vmem>>, vector<128x512xf32>
    %cst_51 = arith.constant dense<0.000000e+00> : vector<1x512xf32>
    %213 = tpu.matmul %210, %212, %cst_51 {dimension_numbers = #tpu.dot_dimension_numbers<[1], [0], [0], [1], [0, 0, 1, 1], [], []>} : vector<1x128xf32>, vector<128x512xf32>, vector<1x512xf32> -> vector<1x512xf32>
    %214 = arith.addf %211, %213 : vector<1x512xf32>
    %215 = vector.extract_strided_slice %214 {offsets = [0, 0], sizes = [1, 128], strides = [1, 1]} : vector<1x512xf32> to vector<1x128xf32>
    %216 = arith.negf %215 : vector<1x128xf32>
    %217 = math.exp %216 : vector<1x128xf32>
    %cst_52 = arith.constant 1.000000e+00 : f32
    %218 = vector.broadcast %cst_52 : f32 to vector<1x128xf32>
    %219 = arith.addf %218, %217 : vector<1x128xf32>
    %220 = arith.divf %218, %219 : vector<1x128xf32>
    %221 = vector.extract_strided_slice %214 {offsets = [0, 128], sizes = [1, 128], strides = [1, 1]} : vector<1x512xf32> to vector<1x128xf32>
    %222 = arith.negf %221 : vector<1x128xf32>
    %223 = math.exp %222 : vector<1x128xf32>
    %cst_53 = arith.constant 1.000000e+00 : f32
    %224 = vector.broadcast %cst_53 : f32 to vector<1x128xf32>
    %225 = arith.addf %224, %223 : vector<1x128xf32>
    %226 = arith.divf %224, %225 : vector<1x128xf32>
    %227 = vector.extract_strided_slice %214 {offsets = [0, 256], sizes = [1, 128], strides = [1, 1]} : vector<1x512xf32> to vector<1x128xf32>
    %228 = math.tanh %227 : vector<1x128xf32>
    %229 = vector.extract_strided_slice %214 {offsets = [0, 384], sizes = [1, 128], strides = [1, 1]} : vector<1x512xf32> to vector<1x128xf32>
    %230 = arith.negf %229 : vector<1x128xf32>
    %231 = math.exp %230 : vector<1x128xf32>
    %cst_54 = arith.constant 1.000000e+00 : f32
    %232 = vector.broadcast %cst_54 : f32 to vector<1x128xf32>
    %233 = arith.addf %232, %231 : vector<1x128xf32>
    %234 = arith.divf %232, %233 : vector<1x128xf32>
    %235 = arith.mulf %226, %208 : vector<1x128xf32>
    %236 = arith.mulf %220, %228 : vector<1x128xf32>
    %237 = arith.addf %235, %236 : vector<1x128xf32>
    %238 = math.tanh %237 : vector<1x128xf32>
    %239 = arith.mulf %234, %238 : vector<1x128xf32>
    %240 = tpu.concatenate %239, %237 in 0 : vector<1x128xf32>, vector<1x128xf32> -> vector<2x128xf32>
    %cst_55 = arith.constant 0.000000e+00 : f32
    %241 = vector.broadcast %cst_55 : f32 to vector<2x128xf32>
    %242 = arith.maximumf %240, %241 : vector<2x128xf32>
    %c0_56 = arith.constant 0 : index
    %c0_57 = arith.constant 0 : index
    %243 = vector.load %arg4[%c0_56, %c0_57] : memref<128x3xf32, #tpu.memory_space<vmem>>, vector<128x3xf32>
    %cst_58 = arith.constant dense<0.000000e+00> : vector<2x3xf32>
    %244 = tpu.matmul %242, %243, %cst_58 {dimension_numbers = #tpu.dot_dimension_numbers<[1], [0], [0], [1], [0, 0, 1, 1], [], []>} : vector<2x128xf32>, vector<128x3xf32>, vector<2x3xf32> -> vector<2x3xf32>
    %c0_59 = arith.constant 0 : index
    %c0_60 = arith.constant 0 : index
    %245 = vector.load %arg5[%c0_59, %c0_60] : memref<1x3xf32, #tpu.memory_space<vmem>>, vector<1x3xf32>
    %246 = vector.broadcast %245 : vector<1x3xf32> to vector<2x3xf32>
    %247 = arith.addf %244, %246 : vector<2x3xf32>
    %c0_61 = arith.constant 0 : index
    %c0_62 = arith.constant 0 : index
    %248 = vector.load %arg6[%c0_61, %c0_62] : memref<2x3xf32, #tpu.memory_space<vmem>>, vector<2x3xf32>
    tpu.vector_store %arg6[%c0_61, %c0_62], %247 {strides = array<i32>} : memref<2x3xf32, #tpu.memory_space<vmem>>, vector<2x3xf32>,
    %249 = vector.extract_strided_slice %247 {offsets = [1, 0], sizes = [1, 3], strides = [1, 1]} : vector<2x3xf32> to vector<1x3xf32>
    %250 = vector.extract_strided_slice %247 {offsets = [0, 0], sizes = [1, 3], strides = [1, 1]} : vector<2x3xf32> to vector<1x3xf32>
    %251 = arith.cmpf ogt, %249, %250 : vector<1x3xf32>
    %c1_i32 = arith.constant 1 : i32
    %c0_i32 = arith.constant 0 : i32
    %252 = vector.broadcast %c1_i32 : i32 to vector<1x3xi32>
    %253 = vector.broadcast %c0_i32 : i32 to vector<1x3xi32>
    %254 = arith.select %251, %252, %253 : vector<1x3xi1>, vector<1x3xi32>
    %c0_63 = arith.constant 0 : index
    %c0_64 = arith.constant 0 : index
    %255 = vector.load %arg7[%c0_63, %c0_64] : memref<1x3xi32, #tpu.memory_space<vmem>>, vector<1x3xi32>
    tpu.vector_store %arg7[%c0_63, %c0_64], %254 {strides = array<i32>} : memref<1x3xi32, #tpu.memory_space<vmem>>, vector<1x3xi32>,
    return
  }
}

</mosaic_0001>

<bundles_post_ra>
// kernel: rnn_forward.1
= control target key start
LH: loop header
LB: loop body
LE: loop exit
PB: predicated region body
PF: predicated region fallthrough
CT: control target
= control target key end

     0   :  { %13 = vsyncpa [#allocation3], 0  ;;  %s3540_s0 = inlined_call_operand.vmem [shape: f32[8,174], index: 0, kind: input, shape index: {}]   ;;  %s3541_s1 = inlined_call_operand.hbm [shape: f32[174,512], index: 1, kind: input, shape index: {}]   ;;  %s3542_s2 = inlined_call_operand.hbm [shape: f32[128,512], index: 2, kind: input, shape index: {}]   ;;  %s3543_s3 = inlined_call_operand.vmem [shape: f32[1,512], index: 3, kind: input, shape index: {}]   ;;  %s3544_s4 = inlined_call_operand.vmem [shape: f32[128,3], index: 4, kind: input, shape index: {}]   ;;  %s3545_s5 = inlined_call_operand.vmem [shape: f32[1,3], index: 5, kind: input, shape index: {}]   ;;  %s3546_s6 = inlined_call_operand.hbm [shape: f32[2,3], index: 6, kind: output, shape index: {0}]   ;;  %s3547_s7 = inlined_call_operand.hbm [shape: s32[1,3], index: 7, kind: output, shape index: {1}]  }
   0x1   :  { %14 = vsyncpa [#allocation6], 0 }
   0x2   :  { %15 = vsyncpa [#allocation4], 0 }
   0x3   :  { %16 = vsyncpa [#allocation9], 0  ;;  %s2960_s24 = smov [#allocation2]   ;;  %s2864_s28 = scalar_lea.hbm %s3541_s1, 11264 }
   0x4   :  { %s24_s25 = sshll.u32 %s2960_s24, 4  ;;  %p2865_p0 = scmp.ne.s32.totalorder %s3541_s1, %s2864_s28  ;;  %s25_s25 = int_to_ptr.vmem [resolvable:$true] %s24_s25 }
   0x5   :  { %p2868_p1 = scmp.lt.u32.totalorder %s2864_s28, %s3541_s1 }
   0x7   :  { %p2870_p2 = pnand %p2868_p1, %p2865_p0 }
   0x9   :  { %2873 = shalt.err (!%p2870_p2)
}
   0xa   :  { %s2874_s10 = scalar_lea.vmem %s25_s25, 11264  ;;  %p2879_p4 = scmp.lt.s32.totalorder %s25_s25, %s25_s25 }
   0xb   :  { %p2875_p3 = scmp.ne.s32.totalorder %s25_s25, %s2874_s10  ;;  %p2880_p5 = scmp.lt.s32.totalorder %s2874_s10, %s2874_s10 }
   0xd   :  { %p2881_p6 = por %p2880_p5, %p2879_p4 }
   0xf   :  { %p2882_p7 = pnand %p2881_p6, %p2875_p3 }
  0x11   :  { %2885 = shalt.err (!%p2882_p7)
}
  0x12   :  { %s2961_s11 = smov 512   ;;  %s2962_s12 = smov 32  }
  0x13   :  { %30 = dma.hbm_to_vmem [thread:$0]  %s3541_s1, 11264, %s25_s25, [#allocation3], %s2961_s11, %s2961_s11, %s2962_s12  }
  0x14   :  { %s2963_s15 = smov [#allocation5]   ;;  %s2886_s19 = scalar_lea.hbm %s3542_s2, 8192 }
  0x15   :  { %s36_s16 = sshll.u32 %s2963_s15, 4  ;;  %p2887_p8 = scmp.ne.s32.totalorder %s3542_s2, %s2886_s19  ;;  %s37_s16 = int_to_ptr.vmem [resolvable:$true] %s36_s16 }
  0x16   :  { %p2890_p9 = scmp.lt.u32.totalorder %s2886_s19, %s3542_s2 }
  0x18   :  { %p2892_p10 = pnand %p2890_p9, %p2887_p8 }
  0x1a   :  { %2895 = shalt.err (!%p2892_p10)
}
  0x1b   :  { %s2896_s24 = scalar_lea.vmem %s37_s16, 8192  ;;  %p2901_p12 = scmp.lt.s32.totalorder %s37_s16, %s37_s16 }
  0x1c   :  { %p2897_p11 = scmp.ne.s32.totalorder %s37_s16, %s2896_s24  ;;  %p2902_p13 = scmp.lt.s32.totalorder %s2896_s24, %s2896_s24 }
  0x1e   :  { %p2903_p0 = por %p2902_p13, %p2901_p12 }
  0x20   :  { %p2904_p1 = pnand %p2903_p0, %p2897_p11 }
  0x22   :  { %2907 = shalt.err (!%p2904_p1)
}
  0x23   :  { %42 = dma.hbm_to_vmem [thread:$0]  %s3542_s2, 8192, %s37_s16, [#allocation6], %s2961_s11, %s2961_s11, %s2962_s12  }
  0x24   :  { %2952 = dma.done.wait [#allocation3], 11264  }
  0x25   :  { %2953 = vsyncadd [#allocation3], 4294956032 }
  0x26   :  { %2954 = dma.done.wait [#allocation6], 8192  }
  0x27   :  { %2955 = vsyncadd [#allocation6], 4294959104  ;;  %v58_v0 = vld [vmem:[#allocation2 + $0x8] sm:$0xff]  ;;  %v60_v2 = vld [vmem:[#allocation2 + $0x18] sm:$0xff]  ;;  %vm167_vm0 = vcmask 375808   ;;  %vm171_vm1 = vcmask 1045504  }
  0x28   :  { %v62_v1 = vld [vmem:[#allocation2 + $0x28] sm:$0xff]  ;;  %v64_v4 = vld [vmem:[#allocation2 + $0x38] sm:$0xff]  ;;  %v57_v5 = vld [vmem:[#allocation2] sm:$0xff]  ;;  %vm2964_vm2 = vmmov 1   ;;  %vm2967_vm4 = vmmov 0   ;;  %vm1879_vm5 = vcmask 1040384  }
  0x29   :  { %v2097_v3 = vpack.c.bf16 %v62_v1, %v58_v0  ;;  %v61_v6 = vld [vmem:[#allocation2 + $0x20] sm:$0xff]  ;;  %v2143_v7 = vpack.c.bf16 %v64_v4, %v60_v2  ;;  %v59_v9 = vld [vmem:[#allocation2 + $0x10] sm:$0xff]  ;;  %v66_v11 = vld [vmem:[#allocation2 + $0x48] sm:$0xff]  ;;  %s2968_s12 = smov [#allocation7]   ;;  %vm1975_vm6 = vcmask 17408   ;;  %s2969_s14 = smov [#allocation8]  }
  0x2a   :  { %v2099_v8 = vpack.c.bf16 %v61_v6, %v57_v5  ;;  %v63_v10 = vld [vmem:[#allocation2 + $0x30] sm:$0xff]  ;;  %v70_v13 = vld [vmem:[#allocation2 + $0x68] sm:$0xff]  ;;  %v68_v14 = vld [vmem:[#allocation2 + $0x58] sm:$0xff]  ;;  %s1990_s13 = sshll.u32 %s2968_s12, 4  ;;  %s2000_s15 = sshll.u32 %s2969_s14, 4  ;;  %s1991_s13 = int_to_ptr.vmem [resolvable:$true] %s1990_s13  ;;  %s2001_s15 = int_to_ptr.vmem [resolvable:$true] %s2000_s15 }
  0x2b   :  { %2098 = vmatprep.subr.bf16.mxu0 %v2097_v3  ;;  %v2145_v12 = vpack.c.bf16 %v63_v10, %v59_v9  ;;  %v72_v15 = vld [vmem:[#allocation2 + $0x78] sm:$0xff]  ;;  %2144 = vmatprep.subr.bf16.mxu1 %v2143_v7  ;;  %v2101_v16 = vpack.c.bf16 %v70_v13, %v66_v11  ;;  %v65_v18 = vld [vmem:[#allocation2 + $0x40] sm:$0xff]  ;;  %v67_v20 = vld [vmem:[#allocation2 + $0x50] sm:$0xff]  ;;  %s2908_s16 = scalar_lea.vmem %s1991_s13, 32  ;;  %p2913_p3 = scmp.lt.s32.totalorder %s1991_s13, %s1991_s13 }
  0x2c   :  { %2100 = vmatpush1.bf16.msra.mxu0 %v2099_v8  ;;  %v2147_v17 = vpack.c.bf16 %v72_v15, %v68_v14  ;;  %v69_v19 = vld [vmem:[#allocation2 + $0x60] sm:$0xff]  ;;  %v71_v22 = vld [vmem:[#allocation2 + $0x70] sm:$0xff]  ;;  %v74_v23 = vld [vmem:[#allocation2 + $0x88] sm:$0xff]  ;;  %p2909_p2 = scmp.ne.s32.totalorder %s1991_s13, %s2908_s16  ;;  %p2914_p4 = scmp.lt.s32.totalorder %s2908_s16, %s2908_s16 }
  0x2d   :  { %2146 = vmatpush1.bf16.msra.mxu1 %v2145_v12  ;;  %v2103_v21 = vpack.c.bf16 %v69_v19, %v65_v18  ;;  %v78_v24 = vld [vmem:[#allocation2 + $0xa8] sm:$0xff]  ;;  %2102 = vmatprep.subr.bf16.mxu0 %v2101_v16  ;;  %v2149_v25 = vpack.c.bf16 %v71_v22, %v67_v20  ;;  %v76_v27 = vld [vmem:[#allocation2 + $0x98] sm:$0xff]  ;;  %v73_v29 = vld [vmem:[#allocation2 + $0x80] sm:$0xff] }
  0x2e   :  { %2148 = vmatprep.subr.bf16.mxu1 %v2147_v17  ;;  %v2105_v26 = vpack.c.bf16 %v78_v24, %v74_v23  ;;  %v80_v28 = vld [vmem:[#allocation2 + $0xb8] sm:$0xff]  ;;  %v77_v31 = vld [vmem:[#allocation2 + $0xa0] sm:$0xff]  ;;  %v75_v32 = vld [vmem:[#allocation2 + $0x90] sm:$0xff]  ;;  %p2915_p5 = por %p2914_p4, %p2913_p3 }
  0x2f   :  { %v2151_v30 = vpack.c.bf16 %v80_v28, %v76_v27  ;;  %v79_v33 = vld [vmem:[#allocation2 + $0xb0] sm:$0xff]  ;;  %v2107_v34 = vpack.c.bf16 %v77_v31, %v73_v29  ;;  %v82_v35 = vld [vmem:[#allocation2 + $0xc8] sm:$0xff]  ;;  %v84_v37 = vld [vmem:[#allocation2 + $0xd8] sm:$0xff] }
  0x30   :  { %2104 = vmatpush1.bf16.msra.mxu0 %v2103_v21  ;;  %v86_v36 = vld [vmem:[#allocation2 + $0xe8] sm:$0xff]  ;;  %v2153_v38 = vpack.c.bf16 %v79_v33, %v75_v32  ;;  %v88_v40 = vld [vmem:[#allocation2 + $0xf8] sm:$0xff]  ;;  %v81_v41 = vld [vmem:[#allocation2 + $0xc0] sm:$0xff]  ;;  %p2916_p6 = pnand %p2915_p5, %p2909_p2 }
  0x31   :  { %2150 = vmatpush1.bf16.msra.mxu1 %v2149_v25  ;;  %2106 = vmatprep.subr.bf16.mxu0 %v2105_v26  ;;  %v2109_v39 = vpack.c.bf16 %v86_v36, %v82_v35  ;;  %v85_v42 = vld [vmem:[#allocation2 + $0xe0] sm:$0xff]  ;;  %v2155_v43 = vpack.c.bf16 %v88_v40, %v84_v37  ;;  %v83_v44 = vld [vmem:[#allocation2 + $0xd0] sm:$0xff]  ;;  %v90_v46 = vld [vmem:[#allocation2 + $0x108] sm:$0xff] }
  0x32   :  { %2152 = vmatprep.subr.bf16.mxu1 %v2151_v30  ;;  %v87_v45 = vld [vmem:[#allocation2 + $0xf0] sm:$0xff]  ;;  %v94_v47 = vld [vmem:[#allocation2 + $0x128] sm:$0xff]  ;;  %v92_v48 = vld [vmem:[#allocation2 + $0x118] sm:$0xff]  ;;  %v2111_v50 = vpack.c.bf16 %v85_v42, %v81_v41 }
  0x33   :  { %v96_v49 = vld [vmem:[#allocation2 + $0x138] sm:$0xff]  ;;  %v2157_v51 = vpack.c.bf16 %v87_v45, %v83_v44  ;;  %v2113_v52 = vpack.c.bf16 %v94_v47, %v90_v46  ;;  %v89_v53 = vld [vmem:[#allocation2 + $0x100] sm:$0xff]  ;;  %v91_v55 = vld [vmem:[#allocation2 + $0x110] sm:$0xff] }
  0x34   :  { %2108 = vmatpush1.bf16.msra.mxu0 %v2107_v34  ;;  %v93_v54 = vld [vmem:[#allocation2 + $0x120] sm:$0xff]  ;;  %v2159_v56 = vpack.c.bf16 %v96_v49, %v92_v48  ;;  %v95_v57 = vld [vmem:[#allocation2 + $0x130] sm:$0xff]  ;;  %v98_v58 = vld [vmem:[#allocation2 + $0x148] sm:$0xff] }
  0x35   :  { %2154 = vmatpush1.bf16.msra.mxu1 %v2153_v38  ;;  %2110 = vmatprep.subr.bf16.mxu0 %v2109_v39  ;;  %v102_v59 = vld [vmem:[#allocation2 + $0x168] sm:$0xff]  ;;  %v100_v60 = vld [vmem:[#allocation2 + $0x158] sm:$0xff]  ;;  %v2115_v62 = vpack.c.bf16 %v93_v54, %v89_v53  ;;  %v2161_v63 = vpack.c.bf16 %v95_v57, %v91_v55  ;;  %v97_v1 = vld [vmem:[#allocation2 + $0x140] sm:$0xff] }
  0x36   :  { %2156 = vmatprep.subr.bf16.mxu1 %v2155_v43  ;;  %v104_v61 = vld [vmem:[#allocation2 + $0x178] sm:$0xff]  ;;  %v2117_v0 = vpack.c.bf16 %v102_v59, %v98_v58  ;;  %v101_v2 = vld [vmem:[#allocation2 + $0x160] sm:$0xff]  ;;  %v99_v3 = vld [vmem:[#allocation2 + $0x150] sm:$0xff] }
  0x37   :  { %v2163_v4 = vpack.c.bf16 %v104_v61, %v100_v60  ;;  %v103_v5 = vld [vmem:[#allocation2 + $0x170] sm:$0xff]  ;;  %v106_v6 = vld [vmem:[#allocation2 + $0x188] sm:$0xff]  ;;  %v108_v8 = vld [vmem:[#allocation2 + $0x198] sm:$0xff]  ;;  %v2119_v10 = vpack.c.bf16 %v101_v2, %v97_v1 }
  0x38   :  { %2112 = vmatpush1.bf16.msra.mxu0 %v2111_v50  ;;  %v110_v7 = vld [vmem:[#allocation2 + $0x1a8] sm:$0xff]  ;;  %v112_v9 = vld [vmem:[#allocation2 + $0x1b8] sm:$0xff]  ;;  %v2165_v11 = vpack.c.bf16 %v103_v5, %v99_v3  ;;  %v105_v13 = vld [vmem:[#allocation2 + $0x180] sm:$0xff] }
  0x39   :  { %2158 = vmatpush1.bf16.msra.mxu1 %v2157_v51  ;;  %2114 = vmatprep.subr.bf16.mxu0 %v2113_v52  ;;  %v2121_v12 = vpack.c.bf16 %v110_v7, %v106_v6  ;;  %v109_v14 = vld [vmem:[#allocation2 + $0x1a0] sm:$0xff]  ;;  %v107_v15 = vld [vmem:[#allocation2 + $0x190] sm:$0xff]  ;;  %v2167_v16 = vpack.c.bf16 %v112_v9, %v108_v8  ;;  %v114_v18 = vld [vmem:[#allocation2 + $0x1c8] sm:$0xff] }
  0x3a   :  { %2160 = vmatprep.subr.bf16.mxu1 %v2159_v56  ;;  %v111_v17 = vld [vmem:[#allocation2 + $0x1b0] sm:$0xff]  ;;  %v118_v19 = vld [vmem:[#allocation2 + $0x1e8] sm:$0xff]  ;;  %v116_v20 = vld [vmem:[#allocation2 + $0x1d8] sm:$0xff]  ;;  %v2123_v22 = vpack.c.bf16 %v109_v14, %v105_v13 }
  0x3b   :  { %v120_v21 = vld [vmem:[#allocation2 + $0x1f8] sm:$0xff]  ;;  %v2169_v23 = vpack.c.bf16 %v111_v17, %v107_v15  ;;  %v2125_v24 = vpack.c.bf16 %v118_v19, %v114_v18  ;;  %v113_v25 = vld [vmem:[#allocation2 + $0x1c0] sm:$0xff]  ;;  %v115_v27 = vld [vmem:[#allocation2 + $0x1d0] sm:$0xff] }
  0x3c   :  { %2116 = vmatpush1.bf16.msra.mxu0 %v2115_v62  ;;  %v117_v26 = vld [vmem:[#allocation2 + $0x1e0] sm:$0xff]  ;;  %v2171_v28 = vpack.c.bf16 %v120_v21, %v116_v20  ;;  %v119_v29 = vld [vmem:[#allocation2 + $0x1f0] sm:$0xff]  ;;  %v122_v30 = vld [vmem:[#allocation2 + $0x208] sm:$0xff] }
  0x3d   :  { %2162 = vmatpush1.bf16.msra.mxu1 %v2161_v63  ;;  %2118 = vmatprep.subr.bf16.mxu0 %v2117_v0  ;;  %v126_v31 = vld [vmem:[#allocation2 + $0x228] sm:$0xff]  ;;  %v124_v32 = vld [vmem:[#allocation2 + $0x218] sm:$0xff]  ;;  %v2127_v34 = vpack.c.bf16 %v117_v26, %v113_v25  ;;  %v121_v35 = vld [vmem:[#allocation2 + $0x200] sm:$0xff]  ;;  %v2173_v36 = vpack.c.bf16 %v119_v29, %v115_v27 }
  0x3e   :  { %2164 = vmatprep.subr.bf16.mxu1 %v2163_v4  ;;  %v128_v33 = vld [vmem:[#allocation2 + $0x238] sm:$0xff]  ;;  %v2129_v37 = vpack.c.bf16 %v126_v31, %v122_v30  ;;  %v125_v38 = vld [vmem:[#allocation2 + $0x220] sm:$0xff]  ;;  %v123_v39 = vld [vmem:[#allocation2 + $0x210] sm:$0xff] }
  0x3f   :  { %v56_v40 = vld [vmem:[%s3540_s0 + $0x8] sm:$0xff]  ;;  %v2175_v41 = vpack.c.bf16 %v128_v33, %v124_v32  ;;  %v127_v42 = vld [vmem:[#allocation2 + $0x230] sm:$0xff]  ;;  %v132_v45 = vld [vmem:[#allocation2 + $0x258] sm:$0xff]  ;;  %v2131_v47 = vpack.c.bf16 %v125_v38, %v121_v35 }
  0x40   :  { %2120 = vmatpush1.bf16.msra.mxu0 %v2119_v10  ;;  %v130_v43 = vld [vmem:[#allocation2 + $0x248] sm:$0xff]  ;;  %2016 = vmatprep.mubr.msk.f32.mxu0 %vm167_vm0, %v56_v40  ;;  %v136_v46 = vld [vmem:[#allocation2 + $0x278] sm:$0xff]  ;;  %v2177_v48 = vpack.c.bf16 %v127_v42, %v123_v39  ;;  %v129_v50 = vld [vmem:[#allocation2 + $0x240] sm:$0xff] }
  0x41   :  { %2166 = vmatpush1.bf16.msra.mxu1 %v2165_v11  ;;  %2122 = vmatprep.subr.bf16.mxu0 %v2121_v12  ;;  %v134_v44 = vld [vmem:[#allocation2 + $0x268] sm:$0xff]  ;;  %v133_v51 = vld [vmem:[#allocation2 + $0x260] sm:$0xff]  ;;  %v131_v52 = vld [vmem:[#allocation2 + $0x250] sm:$0xff]  ;;  %v2179_v53 = vpack.c.bf16 %v136_v46, %v132_v45 }
  0x42   :  { %2168 = vmatprep.subr.bf16.mxu1 %v2167_v16  ;;  %2019 = vmatprep.mubr.msk.f32.mxu1 %vm167_vm0, %v56_v40  ;;  %v2133_v49 = vpack.c.bf16 %v134_v44, %v130_v43  ;;  %v135_v54 = vld [vmem:[#allocation2 + $0x270] sm:$0xff]  ;;  %v138_v55 = vld [vmem:[#allocation2 + $0x288] sm:$0xff]  ;;  %v140_v57 = vld [vmem:[#allocation2 + $0x298] sm:$0xff]  ;;  %v2135_v59 = vpack.c.bf16 %v133_v51, %v129_v50  ;;  %v2965_v43 = vmov 0.0  }
  0x43   :  { %v142_v56 = vld [vmem:[#allocation2 + $0x2a8] sm:$0x3f]  ;;  %v144_v58 = vld [vmem:[#allocation2 + $0x2b8] sm:$0x3f]  ;;  %vm3040_vm3 = vmpackc.low %vm171_vm1, %vm2964_vm2  ;;  %v2181_v61 = vpack.c.bf16 %v135_v54, %v131_v52 }
  0x44   :  { %2124 = vmatpush1.bf16.msra.mxu0 %v2123_v22  ;;  %v2137_v62 = vpack.c.bf16 %v142_v56, %v138_v55  ;;  %v137_v63 = vld [vmem:[#allocation2 + $0x280] sm:$0xff]  ;;  %v139_v1 = vld [vmem:[#allocation2 + $0x290] sm:$0xff]  ;;  %v2183_v2 = vpack.c.bf16 %v144_v58, %v140_v57  ;;  %v327_v4 = vld [vmem:[#allocation5 + $0x8] sm:$0xff] }
  0x45   :  { %2170 = vmatpush1.bf16.msra.mxu1 %v2169_v23  ;;  %2126 = vmatprep.subr.bf16.mxu0 %v2125_v24  ;;  %v141_v0 = vld [vmem:[#allocation2 + $0x2a0] sm:$0x3f]  ;;  %v143_v3 = vld [vmem:[#allocation2 + $0x2b0] sm:$0x3f]  ;;  %v331_v5 = vld [vmem:[#allocation5 + $0x28] sm:$0xff] }
  0x46   :  { %2172 = vmatprep.subr.bf16.mxu1 %v2171_v28  ;;  %v329_v6 = vld [vmem:[#allocation5 + $0x18] sm:$0xff]  ;;  %v2140_v8 = vpack.c.bf16 %v141_v0, %v137_v63  ;;  %v2186_v9 = vpack.c.bf16 %v143_v3, %v139_v1  ;;  %v3046_v10 = vpack.c.bf16 %v331_v5, %v327_v4  ;;  %v326_v11 = vld [vmem:[#allocation5] sm:$0xff]  ;;  %v328_v13 = vld [vmem:[#allocation5 + $0x10] sm:$0xff] }
  0x47   :  { %v333_v7 = vld [vmem:[#allocation5 + $0x38] sm:$0xff]  ;;  %v330_v12 = vld [vmem:[#allocation5 + $0x20] sm:$0xff]  ;;  %v332_v15 = vld [vmem:[#allocation5 + $0x30] sm:$0xff] }
  0x48   :  { %2128 = vmatpush1.bf16.msra.mxu0 %v2127_v34  ;;  %v3050_v14 = vpack.c.bf16 %v333_v7, %v329_v6  ;;  %v335_v16 = vld [vmem:[#allocation5 + $0x48] sm:$0xff]  ;;  %v337_v18 = vld [vmem:[#allocation5 + $0x58] sm:$0xff]  ;;  %v55_v20 = vld [vmem:[%s3540_s0] sm:$0xff]  ;;  %v3057_v21 = vpack.c.bf16 %v330_v12, %v326_v11  ;;  %v3062_v22 = vpack.c.bf16 %v332_v15, %v328_v13 }
  0x49   :  { %2174 = vmatpush1.bf16.msra.mxu1 %v2173_v36  ;;  %2130 = vmatprep.subr.bf16.mxu0 %v2129_v37  ;;  %v339_v17 = vld [vmem:[#allocation5 + $0x68] sm:$0xff]  ;;  %v341_v19 = vld [vmem:[#allocation5 + $0x78] sm:$0xff]  ;;  %v334_v24 = vld [vmem:[#allocation5 + $0x40] sm:$0xff] }
  0x4a   :  { %2176 = vmatprep.subr.bf16.mxu1 %v2175_v41  ;;  %v3064_v23 = vpack.c.bf16 %v339_v17, %v335_v16  ;;  %v338_v25 = vld [vmem:[#allocation5 + $0x60] sm:$0xff]  ;;  %v336_v26 = vld [vmem:[#allocation5 + $0x50] sm:$0xff]  ;;  %v3067_v27 = vpack.c.bf16 %v341_v19, %v337_v18  ;;  %v343_v29 = vld [vmem:[#allocation5 + $0x88] sm:$0xff] }
  0x4b   :  { %v340_v28 = vld [vmem:[#allocation5 + $0x70] sm:$0xff]  ;;  %v347_v30 = vld [vmem:[#allocation5 + $0xa8] sm:$0xff]  ;;  %v345_v31 = vld [vmem:[#allocation5 + $0x98] sm:$0xff]  ;;  %v3070_v33 = vpack.c.bf16 %v338_v25, %v334_v24 }
  0x4c   :  { %2132 = vmatpush1.bf16.msra.mxu0 %v2131_v47  ;;  %v349_v32 = vld [vmem:[#allocation5 + $0xb8] sm:$0xff]  ;;  %v3074_v34 = vpack.c.bf16 %v340_v28, %v336_v26  ;;  %v3076_v35 = vpack.c.bf16 %v347_v30, %v343_v29  ;;  %v342_v36 = vld [vmem:[#allocation5 + $0x80] sm:$0xff]  ;;  %v344_v38 = vld [vmem:[#allocation5 + $0x90] sm:$0xff] }
  0x4d   :  { %2178 = vmatpush1.bf16.msra.mxu1 %v2177_v48  ;;  %2134 = vmatprep.subr.bf16.mxu0 %v2133_v49  ;;  %v346_v37 = vld [vmem:[#allocation5 + $0xa0] sm:$0xff]  ;;  %v3079_v39 = vpack.c.bf16 %v349_v32, %v345_v31  ;;  %v348_v40 = vld [vmem:[#allocation5 + $0xb0] sm:$0xff]  ;;  %v351_v41 = vld [vmem:[#allocation5 + $0xc8] sm:$0xff] }
  0x4e   :  { %2180 = vmatprep.subr.bf16.mxu1 %v2179_v53  ;;  %v355_v42 = vld [vmem:[#allocation5 + $0xe8] sm:$0xff]  ;;  %v353_v44 = vld [vmem:[#allocation5 + $0xd8] sm:$0xff]  ;;  %v3084_v46 = vpack.c.bf16 %v346_v37, %v342_v36  ;;  %v3088_v47 = vpack.c.bf16 %v348_v40, %v344_v38  ;;  %v350_v49 = vld [vmem:[#allocation5 + $0xc0] sm:$0xff] }
  0x4f   :  { %v357_v45 = vld [vmem:[#allocation5 + $0xf8] sm:$0xff]  ;;  %v3090_v48 = vpack.c.bf16 %v355_v42, %v351_v41  ;;  %v354_v50 = vld [vmem:[#allocation5 + $0xe0] sm:$0xff]  ;;  %v352_v51 = vld [vmem:[#allocation5 + $0xd0] sm:$0xff] }
  0x50   :  { %2136 = vmatpush1.bf16.msra.mxu0 %v2135_v59  ;;  %v3093_v52 = vpack.c.bf16 %v357_v45, %v353_v44  ;;  %v356_v53 = vld [vmem:[#allocation5 + $0xf0] sm:$0xff]  ;;  %v359_v54 = vld [vmem:[#allocation5 + $0x108] sm:$0xff]  ;;  %v361_v56 = vld [vmem:[#allocation5 + $0x118] sm:$0xff]  ;;  %v3096_v58 = vpack.c.bf16 %v354_v50, %v350_v49 }
  0x51   :  { %2182 = vmatpush1.bf16.msra.mxu1 %v2181_v61  ;;  %2139 = vmatprep.subr.msk.bf16.mxu0 %vm3040_vm3, %v2137_v62  ;;  %v363_v55 = vld [vmem:[#allocation5 + $0x128] sm:$0xff]  ;;  %v365_v57 = vld [vmem:[#allocation5 + $0x138] sm:$0xff]  ;;  %v3100_v59 = vpack.c.bf16 %v356_v53, %v352_v51  ;;  %v358_v61 = vld [vmem:[#allocation5 + $0x100] sm:$0xff] }
  0x52   :  { %2185 = vmatprep.subr.msk.bf16.mxu1 %vm3040_vm3, %v2183_v2  ;;  %v3102_v60 = vpack.c.bf16 %v363_v55, %v359_v54  ;;  %v362_v62 = vld [vmem:[#allocation5 + $0x120] sm:$0xff]  ;;  %v360_v63 = vld [vmem:[#allocation5 + $0x110] sm:$0xff]  ;;  %v3105_v0 = vpack.c.bf16 %v365_v57, %v361_v56  ;;  %v367_v2 = vld [vmem:[#allocation5 + $0x148] sm:$0xff] }
  0x53   :  { %v364_v1 = vld [vmem:[#allocation5 + $0x130] sm:$0xff]  ;;  %v371_v3 = vld [vmem:[#allocation5 + $0x168] sm:$0xff]  ;;  %v369_v4 = vld [vmem:[#allocation5 + $0x158] sm:$0xff]  ;;  %v3108_v6 = vpack.c.bf16 %v362_v62, %v358_v61  ;;  %v147_v62 = vlaneseq }
  0x54   :  { %2142 = vmatpush1.bf16.msk.msra.mxu0 %vm3040_vm3, %v2140_v8  ;;  %v373_v5 = vld [vmem:[#allocation5 + $0x178] sm:$0xff]  ;;  %v3112_v7 = vpack.c.bf16 %v364_v1, %v360_v63  ;;  %v3114_v8 = vpack.c.bf16 %v371_v3, %v367_v2  ;;  %v370_v11 = vld [vmem:[#allocation5 + $0x160] sm:$0xff]  ;;  %v368_v12 = vld [vmem:[#allocation5 + $0x150] sm:$0xff] }
  0x55   :  { %2188 = vmatpush1.bf16.msk.msra.mxu1 %vm3040_vm3, %v2186_v9  ;;  %2190 = vmatprep.subr.bf16.mxu0 %v3046_v10  ;;  %v366_v9 = vld [vmem:[#allocation5 + $0x140] sm:$0xff]  ;;  %v3117_v13 = vpack.c.bf16 %v373_v5, %v369_v4  ;;  %v372_v15 = vld [vmem:[#allocation5 + $0x170] sm:$0xff]  ;;  %v375_v16 = vld [vmem:[#allocation5 + $0x188] sm:$0xff]  ;;  %v148_v63 = vshrl.u32 %v147_v62, 7 }
  0x56   :  { %2222 = vmatprep.subr.bf16.mxu1 %v3050_v14  ;;  %v379_v17 = vld [vmem:[#allocation5 + $0x1a8] sm:$0xff]  ;;  %v377_v18 = vld [vmem:[#allocation5 + $0x198] sm:$0xff]  ;;  %v3124_v24 = vpack.c.bf16 %v372_v15, %v368_v12  ;;  %v374_v26 = vld [vmem:[#allocation5 + $0x180] sm:$0xff] }
  0x57   :  { %249 = vmatmul.mubr.f32.vlgmr.msra.gmra.mrb[0].mxu0 %v55_v20  ;;  %v381_v19 = vld [vmem:[#allocation5 + $0x1b8] sm:$0xff]  ;;  %v3126_v25 = vpack.c.bf16 %v379_v17, %v375_v16  ;;  %v378_v28 = vld [vmem:[#allocation5 + $0x1a0] sm:$0xff]  ;;  %v376_v29 = vld [vmem:[#allocation5 + $0x190] sm:$0xff]  ;;  %v149_v1 = vsub.s32 0, %v148_v63  ;;  %v153_v3 = vsub.s32 1, %v148_v63 }
  0x58   :  { %320 = vmatmul.mubr.f32.vlgmr.msra.gmra.mrb[0].mxu1 %v55_v20  ;;  %2192 = vmatpush1.bf16.msra.mxu0 %v3057_v21  ;;  %v3120_v20 = vpack.c.bf16 %v370_v11, %v366_v9  ;;  %v3129_v30 = vpack.c.bf16 %v381_v19, %v377_v18  ;;  %v380_v31 = vld [vmem:[#allocation5 + $0x1b0] sm:$0xff]  ;;  %v383_v32 = vld [vmem:[#allocation5 + $0x1c8] sm:$0xff]  ;;  %v385_v37 = vld [vmem:[#allocation5 + $0x1d8] sm:$0xff]  ;;  %v3132_v40 = vpack.c.bf16 %v378_v28, %v374_v26  ;;  %v161_v9 = vsub.s32 3, %v148_v63 }
  0x59   :  { %2224 = vmatpush1.bf16.msra.mxu1 %v3062_v22  ;;  %2194 = vmatprep.subr.bf16.mxu0 %v3064_v23  ;;  %v387_v36 = vld [vmem:[#allocation5 + $0x1e8] sm:$0xff]  ;;  %v389_v38 = vld [vmem:[#allocation5 + $0x1f8] sm:$0xff]  ;;  %v3136_v41 = vpack.c.bf16 %v380_v31, %v376_v29  ;;  %v382_v44 = vld [vmem:[#allocation5 + $0x1c0] sm:$0xff]  ;;  %v157_v29 = vsub.s32 2, %v148_v63 }
  0x5a   :  { %2226 = vmatprep.subr.bf16.mxu1 %v3067_v27  ;;  %454 = vmatprep.mubr.f32.mxu0 %v2965_v43  ;;  %v3138_v42 = vpack.c.bf16 %v387_v36, %v383_v32  ;;  %v386_v45 = vld [vmem:[#allocation5 + $0x1e0] sm:$0xff]  ;;  %v3141_v49 = vpack.c.bf16 %v389_v38, %v385_v37  ;;  %v384_v50 = vld [vmem:[#allocation5 + $0x1d0] sm:$0xff] }
  0x5b   :  { %525 = vmatprep.mubr.f32.mxu1 %v2965_v43  ;;  %v388_v51 = vld [vmem:[#allocation5 + $0x1f0] sm:$0xff]  ;;  %v3144_v53 = vpack.c.bf16 %v386_v45, %v382_v44  ;;  %v145_v2 = vld [vmem:[%s3543_s3] sm:$0xf] }
  0x5c   :  { %2196 = vmatpush1.bf16.msra.mxu0 %v3070_v33  ;;  %v3148_v54 = vpack.c.bf16 %v388_v51, %v384_v50  ;;  %v150_v4 = vrot.slane %v145_v2, %v149_v1  ;;  %v154_v5 = vrot.slane %v145_v2, %v153_v3  ;;  %v162_v19 = vrot.slane %v145_v2, %v161_v9 }
  0x5d   :  { %2228 = vmatpush1.bf16.msra.mxu1 %v3074_v34  ;;  %2198 = vmatprep.subr.bf16.mxu0 %v3076_v35  ;;  %v158_v37 = vrot.slane %v145_v2, %v157_v29 }
  0x5e   :  { %2230 = vmatprep.subr.bf16.mxu1 %v3079_v39 }
  0x60   :  { %2200 = vmatpush1.bf16.msra.mxu0 %v3084_v46 }
  0x61   :  { %2232 = vmatpush1.bf16.msra.mxu1 %v3088_v47  ;;  %2202 = vmatprep.subr.bf16.mxu0 %v3090_v48 }
  0x62   :  { %2234 = vmatprep.subr.bf16.mxu1 %v3093_v52 }
  0x64   :  { %2204 = vmatpush1.bf16.msra.mxu0 %v3096_v58 }
  0x65   :  { %2236 = vmatpush1.bf16.msra.mxu1 %v3100_v59  ;;  %2206 = vmatprep.subr.bf16.mxu0 %v3102_v60 }
  0x66   :  { %2238 = vmatprep.subr.bf16.mxu1 %v3105_v0 }
  0x68   :  { %2208 = vmatpush1.bf16.msra.mxu0 %v3108_v6 }
  0x69   :  { %2240 = vmatpush1.bf16.msra.mxu1 %v3112_v7  ;;  %2210 = vmatprep.subr.bf16.mxu0 %v3114_v8 }
  0x6a   :  { %2242 = vmatprep.subr.bf16.mxu1 %v3117_v13 }
  0x6c   :  { %2212 = vmatpush1.bf16.msra.mxu0 %v3120_v20 }
  0x6d   :  { %2244 = vmatpush1.bf16.msra.mxu1 %v3124_v24  ;;  %2214 = vmatprep.subr.bf16.mxu0 %v3126_v25 }
  0x6e   :  { %2246 = vmatprep.subr.bf16.mxu1 %v3129_v30 }
  0x70   :  { %2216 = vmatpush1.bf16.msra.mxu0 %v3132_v40 }
  0x71   :  { %2248 = vmatpush1.bf16.msra.mxu1 %v3136_v41  ;;  %2218 = vmatprep.subr.bf16.mxu0 %v3138_v42 }
  0x72   :  { %2250 = vmatprep.subr.bf16.mxu1 %v3141_v49 }
  0x74   :  { %2220 = vmatpush1.bf16.msra.mxu0 %v3144_v53 }
  0x75   :  { %2252 = vmatpush1.bf16.msra.mxu1 %v3148_v54  ;;  %2254 = vmatprep.subr.bf16.mxu0 %v3046_v10 }
  0x76   :  { %2286 = vmatprep.subr.bf16.mxu1 %v3050_v14 }
  0x77   :  { %455 = vmatmul.mubr.f32.vlgmr.msra.gmra.mrb[2].mxu0 %v2965_v43 }
  0x78   :  { %526 = vmatmul.mubr.f32.vlgmr.msra.gmra.mrb[2].mxu1 %v2965_v43  ;;  %2256 = vmatpush1.bf16.msra.mxu0 %v3057_v21 }
  0x79   :  { %2288 = vmatpush1.bf16.msra.mxu1 %v3062_v22  ;;  %2258 = vmatprep.subr.bf16.mxu0 %v3064_v23 }
  0x7a   :  { %2290 = vmatprep.subr.bf16.mxu1 %v3067_v27  ;;  %624 = vmatprep.mubr.f32.mxu0 %v2965_v43 }
  0x7b   :  { %695 = vmatprep.mubr.f32.mxu1 %v2965_v43 }
  0x7c   :  { %2260 = vmatpush1.bf16.msra.mxu0 %v3070_v33 }
  0x7d   :  { %2292 = vmatpush1.bf16.msra.mxu1 %v3074_v34  ;;  %2262 = vmatprep.subr.bf16.mxu0 %v3076_v35 }
  0x7e   :  { %2294 = vmatprep.subr.bf16.mxu1 %v3079_v39 }
  0x80   :  { %2264 = vmatpush1.bf16.msra.mxu0 %v3084_v46 }
  0x81   :  { %2296 = vmatpush1.bf16.msra.mxu1 %v3088_v47  ;;  %2266 = vmatprep.subr.bf16.mxu0 %v3090_v48 }
  0x82   :  { %2298 = vmatprep.subr.bf16.mxu1 %v3093_v52 }
  0x84   :  { %2268 = vmatpush1.bf16.msra.mxu0 %v3096_v58 }
  0x85   :  { %2300 = vmatpush1.bf16.msra.mxu1 %v3100_v59  ;;  %2270 = vmatprep.subr.bf16.mxu0 %v3102_v60 }
  0x86   :  { %2302 = vmatprep.subr.bf16.mxu1 %v3105_v0 }
  0x88   :  { %2272 = vmatpush1.bf16.msra.mxu0 %v3108_v6 }
  0x89   :  { %2304 = vmatpush1.bf16.msra.mxu1 %v3112_v7  ;;  %2274 = vmatprep.subr.bf16.mxu0 %v3114_v8 }
  0x8a   :  { %2306 = vmatprep.subr.bf16.mxu1 %v3117_v13 }
  0x8c   :  { %2276 = vmatpush1.bf16.msra.mxu0 %v3120_v20 }
  0x8d   :  { %2308 = vmatpush1.bf16.msra.mxu1 %v3124_v24  ;;  %2278 = vmatprep.subr.bf16.mxu0 %v3126_v25 }
  0x8e   :  { %2310 = vmatprep.subr.bf16.mxu1 %v3129_v30 }
  0x90   :  { %2280 = vmatpush1.bf16.msra.mxu0 %v3132_v40 }
  0x91   :  { %2312 = vmatpush1.bf16.msra.mxu1 %v3136_v41  ;;  %2282 = vmatprep.subr.bf16.mxu0 %v3138_v42 }
  0x92   :  { %2314 = vmatprep.subr.bf16.mxu1 %v3141_v49 }
  0x94   :  { %2284 = vmatpush1.bf16.msra.mxu0 %v3144_v53 }
  0x95   :  { %2316 = vmatpush1.bf16.msra.mxu1 %v3148_v54  ;;  %2318 = vmatprep.subr.bf16.mxu0 %v3046_v10 }
  0x96   :  { %2350 = vmatprep.subr.bf16.mxu1 %v3050_v14 }
 0x12a   :  { %v250_v55 = vpop.f32.mrb[0].mxu0 }
 0x12b   :  { %v252_v56 = vpop.f32.mrb[1].mxu0  ;;  %v321_v57 = vpop.f32.mrb[0].mxu1  ;;  %v3194_v11 = vadd.f32 %v250_v55, %v150_v4 }
 0x12c   :  { %v323_v61 = vpop.f32.mrb[1].mxu1  ;;  %v3196_v12 = vadd.f32 %v252_v56, %v154_v5  ;;  %v3203_v44 = vadd.f32 %v321_v57, %v158_v37 }
 0x12d   :  { %v3200_v36 = vadd.f32 %v323_v61, %v162_v19 }
 0x14a   :  { %v456_v15 = vpop.f32.mrb[2].mxu0 }
 0x14b   :  { %v532_v16 = vadd.f32 %v456_v15, %v3194_v11  ;;  %v527_v17 = vpop.f32.mrb[2].mxu1  ;;  %v458_v18 = vpop.f32.mrb[3].mxu0 }
 0x14c   :  { %v533_v26 = vadd.f32 %v458_v18, %v3196_v12  ;;  %v529_v28 = vpop.f32.mrb[3].mxu1  ;;  %v534_v50 = vadd.f32 %v527_v17, %v3203_v44 }
 0x14d   :  { %v2020_v31 = vmul.f32 -1.442695, %v532_v16  ;;  %v535_v38 = vadd.f32 %v529_v28, %v3200_v36 }
 0x14e   :  { %v2021_v32 = vmul.f32 -1.442695, %v533_v26 }
 0x14f   :  { %2736 = vpow2.f32 %v2020_v31  ;;  %v2022_v45 = vmul.f32 -1.442695, %v535_v38 }
 0x150   :  { %2738 = vpow2.f32 %v2021_v32 }
 0x151   :  { %2740 = vpow2.f32 %v2022_v45 }
 0x152   :  { %2742 = vtanh.f32 %v534_v50 }
 0x159   :  { %v2737_v51 = vpop.eup %2736 }
 0x15a   :  { %v2739_v55 = vpop.eup %2738  ;;  %v539_v56 = vadd.f32 1.0, %v2737_v51 }
 0x15b   :  { %v545_v62 = vadd.f32 1.0, %v2739_v55  ;;  %v2741_v63 = vpop.eup %2740 }
 0x15c   :  { %2744 = vrcp.f32 %v539_v56  ;;  %v2743_v61 = vpop.eup %2742  ;;  %v552_v4 = vadd.f32 1.0, %v2741_v63 }
 0x15d   :  { %2746 = vrcp.f32 %v545_v62 }
 0x15e   :  { %2748 = vrcp.f32 %v552_v4 }
 0x166   :  { %v2745_v1 = vpop.eup %2744 }
 0x167   :  { %v2747_v3 = vpop.eup %2746  ;;  %v556_v2 = vmul.f32 %v2745_v1, %v2743_v61 }
 0x168   :  { %v555_v5 = vmul.f32 0.0, %v2747_v3  ;;  %v2749_v9 = vpop.eup %2748 }
 0x16a   :  { %v3206_v57 = vadd.f32 %v556_v2, %v555_v5 }
 0x16c   :  { %2750 = vtanh.f32 %v3206_v57  ;;  %v738_v5 = vrot.slane %v3206_v57, 7 }
 0x176   :  { %v2751_v15 = vpop.eup %2750 }
 0x177   :  { %v559_v16 = vmul.f32 %v2751_v15, %v2749_v9 }
 0x179   :  { %625 = vmatmul.mubr.f32.vlgmr.msra.gmra.mrb[4].mxu0 %v559_v16  ;;  %696 = vmatmul.mubr.f32.vlgmr.msra.gmra.mrb[4].mxu1 %v559_v16 }
 0x17a   :  { %2320 = vmatpush1.bf16.msra.mxu0 %v3057_v21  ;;  %2352 = vmatpush1.bf16.msra.mxu1 %v3062_v22 }
 0x17b   :  { %2322 = vmatprep.subr.bf16.mxu0 %v3064_v23  ;;  %2354 = vmatprep.subr.bf16.mxu1 %v3067_v27 }
 0x17c   :  { %812 = vmatprep.mubr.f32.mxu0 %v2965_v43  ;;  %883 = vmatprep.mubr.f32.mxu1 %v2965_v43 }
 0x17e   :  { %2324 = vmatpush1.bf16.msra.mxu0 %v3070_v33  ;;  %2356 = vmatpush1.bf16.msra.mxu1 %v3074_v34 }
 0x17f   :  { %2326 = vmatprep.subr.bf16.mxu0 %v3076_v35  ;;  %2358 = vmatprep.subr.bf16.mxu1 %v3079_v39 }
 0x182   :  { %2328 = vmatpush1.bf16.msra.mxu0 %v3084_v46  ;;  %2360 = vmatpush1.bf16.msra.mxu1 %v3088_v47 }
 0x183   :  { %2330 = vmatprep.subr.bf16.mxu0 %v3090_v48  ;;  %2362 = vmatprep.subr.bf16.mxu1 %v3093_v52 }
 0x186   :  { %2332 = vmatpush1.bf16.msra.mxu0 %v3096_v58  ;;  %2364 = vmatpush1.bf16.msra.mxu1 %v3100_v59 }
 0x187   :  { %2334 = vmatprep.subr.bf16.mxu0 %v3102_v60  ;;  %2366 = vmatprep.subr.bf16.mxu1 %v3105_v0 }
 0x18a   :  { %2336 = vmatpush1.bf16.msra.mxu0 %v3108_v6  ;;  %2368 = vmatpush1.bf16.msra.mxu1 %v3112_v7 }
 0x18b   :  { %2338 = vmatprep.subr.bf16.mxu0 %v3114_v8  ;;  %2370 = vmatprep.subr.bf16.mxu1 %v3117_v13 }
 0x18e   :  { %2340 = vmatpush1.bf16.msra.mxu0 %v3120_v20  ;;  %2372 = vmatpush1.bf16.msra.mxu1 %v3124_v24 }
 0x18f   :  { %2342 = vmatprep.subr.bf16.mxu0 %v3126_v25  ;;  %2374 = vmatprep.subr.bf16.mxu1 %v3129_v30 }
 0x192   :  { %2344 = vmatpush1.bf16.msra.mxu0 %v3132_v40  ;;  %2376 = vmatpush1.bf16.msra.mxu1 %v3136_v41 }
 0x193   :  { %2346 = vmatprep.subr.bf16.mxu0 %v3138_v42  ;;  %2378 = vmatprep.subr.bf16.mxu1 %v3141_v49 }
 0x196   :  { %2348 = vmatpush1.bf16.msra.mxu0 %v3144_v53  ;;  %2380 = vmatpush1.bf16.msra.mxu1 %v3148_v54 }
 0x197   :  { %2382 = vmatprep.subr.bf16.mxu0 %v3046_v10  ;;  %2414 = vmatprep.subr.bf16.mxu1 %v3050_v14 }
 0x24c   :  { %v626_v17 = vpop.f32.mrb[4].mxu0  ;;  %v697_v18 = vpop.f32.mrb[4].mxu1 }
 0x24d   :  { %v706_v19 = vrot.slane %v626_v17, 7  ;;  %v628_v26 = vpop.f32.mrb[5].mxu0  ;;  %v699_v28 = vpop.f32.mrb[5].mxu1  ;;  %v708_v51 = vrot.slane %v697_v18, 7 }
 0x24e   :  { %v707_v29 = vrot.slane %v628_v26, 7  ;;  %v709_v45 = vrot.slane %v699_v28, 7 }
 0x24f   :  { %v714_v31 = vadd.f32 %v706_v19, %v3194_v11  ;;  %v716_v56 = vadd.f32 %v708_v51, %v3203_v44 }
 0x250   :  { %v715_v32 = vadd.f32 %v707_v29, %v3196_v12  ;;  %v717_v50 = vadd.f32 %v709_v45, %v3200_v36 }
 0x251   :  { %v2023_v37 = vmul.f32 -1.442695, %v714_v31 }
 0x252   :  { %v2024_v38 = vmul.f32 -1.442695, %v715_v32  ;;  %v2025_v55 = vmul.f32 -1.442695, %v717_v50 }
 0x253   :  { %2752 = vpow2.f32 %v2023_v37 }
 0x254   :  { %2754 = vpow2.f32 %v2024_v38 }
 0x255   :  { %2756 = vpow2.f32 %v2025_v55 }
 0x256   :  { %2758 = vtanh.f32 %v716_v56 }
 0x25d   :  { %v2753_v62 = vpop.eup %2752 }
 0x25e   :  { %v2755_v63 = vpop.eup %2754  ;;  %v721_v61 = vadd.f32 1.0, %v2753_v62 }
 0x25f   :  { %v727_v1 = vadd.f32 1.0, %v2755_v63  ;;  %v2757_v3 = vpop.eup %2756 }
 0x260   :  { %2760 = vrcp.f32 %v721_v61  ;;  %v2759_v2 = vpop.eup %2758  ;;  %v734_v16 = vadd.f32 1.0, %v2757_v3 }
 0x261   :  { %2762 = vrcp.f32 %v727_v1 }
 0x262   :  { %2764 = vrcp.f32 %v734_v16 }
 0x26a   :  { %v2761_v4 = vpop.eup %2760 }
 0x26b   :  { %v2763_v9 = vpop.eup %2762  ;;  %v741_v15 = vmul.f32 %v2761_v4, %v2759_v2 }
 0x26c   :  { %v740_v17 = vmul.f32 %v2763_v9, %v738_v5  ;;  %v2765_v19 = vpop.eup %2764 }
 0x26e   :  { %v3248_v18 = vadd.f32 %v741_v15, %v740_v17 }
 0x270   :  { %2766 = vtanh.f32 %v3248_v18 }
 0x27a   :  { %v2767_v26 = vpop.eup %2766 }
 0x27b   :  { %v744_v28 = vmul.f32 %v2767_v26, %v2765_v19  ;;  %v926_v19 = vrot.slane %v3248_v18, 7 }
 0x27d   :  { %v746_v29 = vrot.slane %v744_v28, 1 }
 0x27f   :  { %813 = vmatmul.mubr.f32.vlgmr.msra.gmra.mrb[6].mxu0 %v746_v29  ;;  %884 = vmatmul.mubr.f32.vlgmr.msra.gmra.mrb[6].mxu1 %v746_v29 }
 0x280   :  { %2384 = vmatpush1.bf16.msra.mxu0 %v3057_v21  ;;  %2416 = vmatpush1.bf16.msra.mxu1 %v3062_v22 }
 0x281   :  { %2386 = vmatprep.subr.bf16.mxu0 %v3064_v23  ;;  %2418 = vmatprep.subr.bf16.mxu1 %v3067_v27 }
 0x282   :  { %1000 = vmatprep.mubr.f32.mxu0 %v2965_v43  ;;  %1071 = vmatprep.mubr.f32.mxu1 %v2965_v43 }
 0x284   :  { %2388 = vmatpush1.bf16.msra.mxu0 %v3070_v33  ;;  %2420 = vmatpush1.bf16.msra.mxu1 %v3074_v34 }
 0x285   :  { %2390 = vmatprep.subr.bf16.mxu0 %v3076_v35  ;;  %2422 = vmatprep.subr.bf16.mxu1 %v3079_v39 }
 0x288   :  { %2392 = vmatpush1.bf16.msra.mxu0 %v3084_v46  ;;  %2424 = vmatpush1.bf16.msra.mxu1 %v3088_v47 }
 0x289   :  { %2394 = vmatprep.subr.bf16.mxu0 %v3090_v48  ;;  %2426 = vmatprep.subr.bf16.mxu1 %v3093_v52 }
 0x28c   :  { %2396 = vmatpush1.bf16.msra.mxu0 %v3096_v58  ;;  %2428 = vmatpush1.bf16.msra.mxu1 %v3100_v59 }
 0x28d   :  { %2398 = vmatprep.subr.bf16.mxu0 %v3102_v60  ;;  %2430 = vmatprep.subr.bf16.mxu1 %v3105_v0 }
 0x290   :  { %2400 = vmatpush1.bf16.msra.mxu0 %v3108_v6  ;;  %2432 = vmatpush1.bf16.msra.mxu1 %v3112_v7 }
 0x291   :  { %2402 = vmatprep.subr.bf16.mxu0 %v3114_v8  ;;  %2434 = vmatprep.subr.bf16.mxu1 %v3117_v13 }
 0x294   :  { %2404 = vmatpush1.bf16.msra.mxu0 %v3120_v20  ;;  %2436 = vmatpush1.bf16.msra.mxu1 %v3124_v24 }
 0x295   :  { %2406 = vmatprep.subr.bf16.mxu0 %v3126_v25  ;;  %2438 = vmatprep.subr.bf16.mxu1 %v3129_v30 }
 0x298   :  { %2408 = vmatpush1.bf16.msra.mxu0 %v3132_v40  ;;  %2440 = vmatpush1.bf16.msra.mxu1 %v3136_v41 }
 0x299   :  { %2410 = vmatprep.subr.bf16.mxu0 %v3138_v42  ;;  %2442 = vmatprep.subr.bf16.mxu1 %v3141_v49 }
 0x29c   :  { %2412 = vmatpush1.bf16.msra.mxu0 %v3144_v53  ;;  %2444 = vmatpush1.bf16.msra.mxu1 %v3148_v54 }
 0x29d   :  { %2446 = vmatprep.subr.bf16.mxu0 %v3046_v10  ;;  %2478 = vmatprep.subr.bf16.mxu1 %v3050_v14 }
 0x352   :  { %v814_v57 = vpop.f32.mrb[6].mxu0  ;;  %v885_v31 = vpop.f32.mrb[6].mxu1 }
 0x353   :  { %v894_v32 = vrot.slane %v814_v57, 6  ;;  %v816_v37 = vpop.f32.mrb[7].mxu0  ;;  %v887_v38 = vpop.f32.mrb[7].mxu1  ;;  %v896_v61 = vrot.slane %v885_v31, 6 }
 0x354   :  { %v895_v45 = vrot.slane %v816_v37, 6  ;;  %v897_v62 = vrot.slane %v887_v38, 6 }
 0x355   :  { %v902_v50 = vadd.f32 %v894_v32, %v3194_v11  ;;  %v904_v3 = vadd.f32 %v896_v61, %v3203_v44 }
 0x356   :  { %v903_v51 = vadd.f32 %v895_v45, %v3196_v12  ;;  %v905_v63 = vadd.f32 %v897_v62, %v3200_v36 }
 0x357   :  { %v2026_v55 = vmul.f32 -1.442695, %v902_v50 }
 0x358   :  { %v2027_v56 = vmul.f32 -1.442695, %v903_v51  ;;  %v2028_v1 = vmul.f32 -1.442695, %v905_v63 }
 0x359   :  { %2768 = vpow2.f32 %v2026_v55 }
 0x35a   :  { %2770 = vpow2.f32 %v2027_v56 }
 0x35b   :  { %2772 = vpow2.f32 %v2028_v1 }
 0x35c   :  { %2774 = vtanh.f32 %v904_v3 }
 0x363   :  { %v2769_v2 = vpop.eup %2768 }
 0x364   :  { %v2771_v4 = vpop.eup %2770  ;;  %v909_v5 = vadd.f32 1.0, %v2769_v2 }
 0x365   :  { %v915_v9 = vadd.f32 1.0, %v2771_v4  ;;  %v2773_v15 = vpop.eup %2772 }
 0x366   :  { %2776 = vrcp.f32 %v909_v5  ;;  %v2775_v16 = vpop.eup %2774  ;;  %v922_v29 = vadd.f32 1.0, %v2773_v15 }
 0x367   :  { %2778 = vrcp.f32 %v915_v9 }
 0x368   :  { %2780 = vrcp.f32 %v922_v29 }
 0x370   :  { %v2777_v17 = vpop.eup %2776 }
 0x371   :  { %v2779_v26 = vpop.eup %2778  ;;  %v929_v28 = vmul.f32 %v2777_v17, %v2775_v16 }
 0x372   :  { %v928_v57 = vmul.f32 %v2779_v26, %v926_v19  ;;  %v2781_v32 = vpop.eup %2780 }
 0x374   :  { %v3290_v31 = vadd.f32 %v929_v28, %v928_v57 }
 0x376   :  { %2782 = vtanh.f32 %v3290_v31 }
 0x380   :  { %v2783_v37 = vpop.eup %2782 }
 0x381   :  { %v932_v38 = vmul.f32 %v2783_v37, %v2781_v32  ;;  %v1114_v32 = vrot.slane %v3290_v31, 7 }
 0x383   :  { %v934_v45 = vrot.slane %v932_v38, 2 }
 0x385   :  { %1001 = vmatmul.mubr.f32.vlgmr.msra.gmra.mrb[8].mxu0 %v934_v45  ;;  %1072 = vmatmul.mubr.f32.vlgmr.msra.gmra.mrb[8].mxu1 %v934_v45 }
 0x386   :  { %2448 = vmatpush1.bf16.msra.mxu0 %v3057_v21  ;;  %2480 = vmatpush1.bf16.msra.mxu1 %v3062_v22 }
 0x387   :  { %2450 = vmatprep.subr.bf16.mxu0 %v3064_v23  ;;  %2482 = vmatprep.subr.bf16.mxu1 %v3067_v27 }
 0x388   :  { %1188 = vmatprep.mubr.f32.mxu0 %v2965_v43  ;;  %1259 = vmatprep.mubr.f32.mxu1 %v2965_v43 }
 0x38a   :  { %2452 = vmatpush1.bf16.msra.mxu0 %v3070_v33  ;;  %2484 = vmatpush1.bf16.msra.mxu1 %v3074_v34 }
 0x38b   :  { %2454 = vmatprep.subr.bf16.mxu0 %v3076_v35  ;;  %2486 = vmatprep.subr.bf16.mxu1 %v3079_v39 }
 0x38e   :  { %2456 = vmatpush1.bf16.msra.mxu0 %v3084_v46  ;;  %2488 = vmatpush1.bf16.msra.mxu1 %v3088_v47 }
 0x38f   :  { %2458 = vmatprep.subr.bf16.mxu0 %v3090_v48  ;;  %2490 = vmatprep.subr.bf16.mxu1 %v3093_v52 }
 0x392   :  { %2460 = vmatpush1.bf16.msra.mxu0 %v3096_v58  ;;  %2492 = vmatpush1.bf16.msra.mxu1 %v3100_v59 }
 0x393   :  { %2462 = vmatprep.subr.bf16.mxu0 %v3102_v60  ;;  %2494 = vmatprep.subr.bf16.mxu1 %v3105_v0 }
 0x396   :  { %2464 = vmatpush1.bf16.msra.mxu0 %v3108_v6  ;;  %2496 = vmatpush1.bf16.msra.mxu1 %v3112_v7 }
 0x397   :  { %2466 = vmatprep.subr.bf16.mxu0 %v3114_v8  ;;  %2498 = vmatprep.subr.bf16.mxu1 %v3117_v13 }
 0x39a   :  { %2468 = vmatpush1.bf16.msra.mxu0 %v3120_v20  ;;  %2500 = vmatpush1.bf16.msra.mxu1 %v3124_v24 }
 0x39b   :  { %2470 = vmatprep.subr.bf16.mxu0 %v3126_v25  ;;  %2502 = vmatprep.subr.bf16.mxu1 %v3129_v30 }
 0x39e   :  { %2472 = vmatpush1.bf16.msra.mxu0 %v3132_v40  ;;  %2504 = vmatpush1.bf16.msra.mxu1 %v3136_v41 }
 0x39f   :  { %2474 = vmatprep.subr.bf16.mxu0 %v3138_v42  ;;  %2506 = vmatprep.subr.bf16.mxu1 %v3141_v49 }
 0x3a2   :  { %2476 = vmatpush1.bf16.msra.mxu0 %v3144_v53  ;;  %2508 = vmatpush1.bf16.msra.mxu1 %v3148_v54 }
 0x3a3   :  { %2510 = vmatprep.subr.bf16.mxu0 %v3046_v10  ;;  %2542 = vmatprep.subr.bf16.mxu1 %v3050_v14 }
 0x458   :  { %v1002_v18 = vpop.f32.mrb[8].mxu0  ;;  %v1073_v50 = vpop.f32.mrb[8].mxu1 }
 0x459   :  { %v1082_v51 = vrot.slane %v1002_v18, 5  ;;  %v1004_v55 = vpop.f32.mrb[9].mxu0  ;;  %v1075_v56 = vpop.f32.mrb[9].mxu1  ;;  %v1084_v5 = vrot.slane %v1073_v50, 5 }
 0x45a   :  { %v1083_v62 = vrot.slane %v1004_v55, 5  ;;  %v1085_v2 = vrot.slane %v1075_v56, 5 }
 0x45b   :  { %v1090_v63 = vadd.f32 %v1082_v51, %v3194_v11  ;;  %v1092_v15 = vadd.f32 %v1084_v5, %v3203_v44 }
 0x45c   :  { %v1091_v61 = vadd.f32 %v1083_v62, %v3196_v12  ;;  %v1093_v4 = vadd.f32 %v1085_v2, %v3200_v36 }
 0x45d   :  { %v2029_v1 = vmul.f32 -1.442695, %v1090_v63 }
 0x45e   :  { %v2030_v3 = vmul.f32 -1.442695, %v1091_v61  ;;  %v2031_v9 = vmul.f32 -1.442695, %v1093_v4 }
 0x45f   :  { %2784 = vpow2.f32 %v2029_v1 }
 0x460   :  { %2786 = vpow2.f32 %v2030_v3 }
 0x461   :  { %2788 = vpow2.f32 %v2031_v9 }
 0x462   :  { %2790 = vtanh.f32 %v1092_v15 }
 0x469   :  { %v2785_v16 = vpop.eup %2784 }
 0x46a   :  { %v2787_v17 = vpop.eup %2786  ;;  %v1097_v19 = vadd.f32 1.0, %v2785_v16 }
 0x46b   :  { %v1103_v26 = vadd.f32 1.0, %v2787_v17  ;;  %v2789_v28 = vpop.eup %2788 }
 0x46c   :  { %2792 = vrcp.f32 %v1097_v19  ;;  %v2791_v29 = vpop.eup %2790  ;;  %v1110_v45 = vadd.f32 1.0, %v2789_v28 }
 0x46d   :  { %2794 = vrcp.f32 %v1103_v26 }
 0x46e   :  { %2796 = vrcp.f32 %v1110_v45 }
 0x476   :  { %v2793_v57 = vpop.eup %2792 }
 0x477   :  { %v2795_v37 = vpop.eup %2794  ;;  %v1117_v38 = vmul.f32 %v2793_v57, %v2791_v29 }
 0x478   :  { %v1116_v18 = vmul.f32 %v2795_v37, %v1114_v32  ;;  %v2797_v51 = vpop.eup %2796 }
 0x47a   :  { %v3332_v50 = vadd.f32 %v1117_v38, %v1116_v18 }
 0x47c   :  { %2798 = vtanh.f32 %v3332_v50 }
 0x486   :  { %v2799_v55 = vpop.eup %2798 }
 0x487   :  { %v1120_v56 = vmul.f32 %v2799_v55, %v2797_v51  ;;  %v1302_v51 = vrot.slane %v3332_v50, 7 }
 0x489   :  { %v1122_v62 = vrot.slane %v1120_v56, 3 }
 0x48b   :  { %1189 = vmatmul.mubr.f32.vlgmr.msra.gmra.mrb[10].mxu0 %v1122_v62  ;;  %1260 = vmatmul.mubr.f32.vlgmr.msra.gmra.mrb[10].mxu1 %v1122_v62 }
 0x48c   :  { %2512 = vmatpush1.bf16.msra.mxu0 %v3057_v21  ;;  %2544 = vmatpush1.bf16.msra.mxu1 %v3062_v22 }
 0x48d   :  { %2514 = vmatprep.subr.bf16.mxu0 %v3064_v23  ;;  %2546 = vmatprep.subr.bf16.mxu1 %v3067_v27 }
 0x48e   :  { %1376 = vmatprep.mubr.f32.mxu0 %v2965_v43  ;;  %1447 = vmatprep.mubr.f32.mxu1 %v2965_v43 }
 0x490   :  { %2516 = vmatpush1.bf16.msra.mxu0 %v3070_v33  ;;  %2548 = vmatpush1.bf16.msra.mxu1 %v3074_v34 }
 0x491   :  { %2518 = vmatprep.subr.bf16.mxu0 %v3076_v35  ;;  %2550 = vmatprep.subr.bf16.mxu1 %v3079_v39 }
 0x494   :  { %2520 = vmatpush1.bf16.msra.mxu0 %v3084_v46  ;;  %2552 = vmatpush1.bf16.msra.mxu1 %v3088_v47 }
 0x495   :  { %2522 = vmatprep.subr.bf16.mxu0 %v3090_v48  ;;  %2554 = vmatprep.subr.bf16.mxu1 %v3093_v52 }
 0x498   :  { %2524 = vmatpush1.bf16.msra.mxu0 %v3096_v58  ;;  %2556 = vmatpush1.bf16.msra.mxu1 %v3100_v59 }
 0x499   :  { %2526 = vmatprep.subr.bf16.mxu0 %v3102_v60  ;;  %2558 = vmatprep.subr.bf16.mxu1 %v3105_v0 }
 0x49c   :  { %2528 = vmatpush1.bf16.msra.mxu0 %v3108_v6  ;;  %2560 = vmatpush1.bf16.msra.mxu1 %v3112_v7 }
 0x49d   :  { %2530 = vmatprep.subr.bf16.mxu0 %v3114_v8  ;;  %2562 = vmatprep.subr.bf16.mxu1 %v3117_v13 }
 0x4a0   :  { %2532 = vmatpush1.bf16.msra.mxu0 %v3120_v20  ;;  %2564 = vmatpush1.bf16.msra.mxu1 %v3124_v24 }
 0x4a1   :  { %2534 = vmatprep.subr.bf16.mxu0 %v3126_v25  ;;  %2566 = vmatprep.subr.bf16.mxu1 %v3129_v30 }
 0x4a4   :  { %2536 = vmatpush1.bf16.msra.mxu0 %v3132_v40  ;;  %2568 = vmatpush1.bf16.msra.mxu1 %v3136_v41 }
 0x4a5   :  { %2538 = vmatprep.subr.bf16.mxu0 %v3138_v42  ;;  %2570 = vmatprep.subr.bf16.mxu1 %v3141_v49 }
 0x4a8   :  { %2540 = vmatpush1.bf16.msra.mxu0 %v3144_v53  ;;  %2572 = vmatpush1.bf16.msra.mxu1 %v3148_v54 }
 0x4a9   :  { %2574 = vmatprep.subr.bf16.mxu0 %v3046_v10  ;;  %2606 = vmatprep.subr.bf16.mxu1 %v3050_v14 }
 0x55e   :  { %v1190_v31 = vpop.f32.mrb[10].mxu0  ;;  %v1261_v63 = vpop.f32.mrb[10].mxu1 }
 0x55f   :  { %v1270_v61 = vrot.slane %v1190_v31, 4  ;;  %v1192_v1 = vpop.f32.mrb[11].mxu0  ;;  %v1263_v3 = vpop.f32.mrb[11].mxu1  ;;  %v1272_v19 = vrot.slane %v1261_v63, 4 }
 0x560   :  { %v1271_v2 = vrot.slane %v1192_v1, 4  ;;  %v1273_v16 = vrot.slane %v1263_v3, 4 }
 0x561   :  { %v1278_v4 = vadd.f32 %v1270_v61, %v3194_v11  ;;  %v1280_v28 = vadd.f32 %v1272_v19, %v3203_v44 }
 0x562   :  { %v1279_v5 = vadd.f32 %v1271_v2, %v3196_v12  ;;  %v1281_v17 = vadd.f32 %v1273_v16, %v3200_v36 }
 0x563   :  { %v2032_v9 = vmul.f32 -1.442695, %v1278_v4 }
 0x564   :  { %v2033_v15 = vmul.f32 -1.442695, %v1279_v5  ;;  %v2034_v26 = vmul.f32 -1.442695, %v1281_v17 }
 0x565   :  { %2800 = vpow2.f32 %v2032_v9 }
 0x566   :  { %2802 = vpow2.f32 %v2033_v15 }
 0x567   :  { %2804 = vpow2.f32 %v2034_v26 }
 0x568   :  { %2806 = vtanh.f32 %v1280_v28 }
 0x56f   :  { %v2801_v29 = vpop.eup %2800 }
 0x570   :  { %v2803_v57 = vpop.eup %2802  ;;  %v1285_v32 = vadd.f32 1.0, %v2801_v29 }
 0x571   :  { %v1291_v37 = vadd.f32 1.0, %v2803_v57  ;;  %v2805_v38 = vpop.eup %2804 }
 0x572   :  { %2808 = vrcp.f32 %v1285_v32  ;;  %v2807_v45 = vpop.eup %2806  ;;  %v1298_v62 = vadd.f32 1.0, %v2805_v38 }
 0x573   :  { %2810 = vrcp.f32 %v1291_v37 }
 0x574   :  { %2812 = vrcp.f32 %v1298_v62 }
 0x57c   :  { %v2809_v18 = vpop.eup %2808 }
 0x57d   :  { %v2811_v55 = vpop.eup %2810  ;;  %v1305_v56 = vmul.f32 %v2809_v18, %v2807_v45 }
 0x57e   :  { %v1304_v31 = vmul.f32 %v2811_v55, %v1302_v51  ;;  %v2813_v61 = vpop.eup %2812 }
 0x580   :  { %v3374_v63 = vadd.f32 %v1305_v56, %v1304_v31 }
 0x582   :  { %2814 = vtanh.f32 %v3374_v63  ;;  %v1490_v62 = vrot.slane %v3374_v63, 7 }
 0x58c   :  { %v2815_v1 = vpop.eup %2814 }
 0x58d   :  { %v1308_v3 = vmul.f32 %v2815_v1, %v2813_v61 }
 0x58f   :  { %v1310_v2 = vrot.slane %v1308_v3, 4 }
 0x591   :  { %1377 = vmatmul.mubr.f32.vlgmr.msra.gmra.mrb[12].mxu0 %v1310_v2  ;;  %1448 = vmatmul.mubr.f32.vlgmr.msra.gmra.mrb[12].mxu1 %v1310_v2 }
 0x592   :  { %2576 = vmatpush1.bf16.msra.mxu0 %v3057_v21  ;;  %2608 = vmatpush1.bf16.msra.mxu1 %v3062_v22 }
 0x593   :  { %2578 = vmatprep.subr.bf16.mxu0 %v3064_v23  ;;  %2610 = vmatprep.subr.bf16.mxu1 %v3067_v27 }
 0x594   :  { %1564 = vmatprep.mubr.f32.mxu0 %v2965_v43  ;;  %1635 = vmatprep.mubr.f32.mxu1 %v2965_v43 }
 0x596   :  { %2580 = vmatpush1.bf16.msra.mxu0 %v3070_v33  ;;  %2612 = vmatpush1.bf16.msra.mxu1 %v3074_v34 }
 0x597   :  { %2582 = vmatprep.subr.bf16.mxu0 %v3076_v35  ;;  %2614 = vmatprep.subr.bf16.mxu1 %v3079_v39 }
 0x59a   :  { %2584 = vmatpush1.bf16.msra.mxu0 %v3084_v46  ;;  %2616 = vmatpush1.bf16.msra.mxu1 %v3088_v47 }
 0x59b   :  { %2586 = vmatprep.subr.bf16.mxu0 %v3090_v48  ;;  %2618 = vmatprep.subr.bf16.mxu1 %v3093_v52 }
 0x59e   :  { %2588 = vmatpush1.bf16.msra.mxu0 %v3096_v58  ;;  %2620 = vmatpush1.bf16.msra.mxu1 %v3100_v59 }
 0x59f   :  { %2590 = vmatprep.subr.bf16.mxu0 %v3102_v60  ;;  %2622 = vmatprep.subr.bf16.mxu1 %v3105_v0 }
 0x5a2   :  { %2592 = vmatpush1.bf16.msra.mxu0 %v3108_v6  ;;  %2624 = vmatpush1.bf16.msra.mxu1 %v3112_v7 }
 0x5a3   :  { %2594 = vmatprep.subr.bf16.mxu0 %v3114_v8  ;;  %2626 = vmatprep.subr.bf16.mxu1 %v3117_v13 }
 0x5a6   :  { %2596 = vmatpush1.bf16.msra.mxu0 %v3120_v20  ;;  %2628 = vmatpush1.bf16.msra.mxu1 %v3124_v24 }
 0x5a7   :  { %2598 = vmatprep.subr.bf16.mxu0 %v3126_v25  ;;  %2630 = vmatprep.subr.bf16.mxu1 %v3129_v30 }
 0x5aa   :  { %2600 = vmatpush1.bf16.msra.mxu0 %v3132_v40  ;;  %2632 = vmatpush1.bf16.msra.mxu1 %v3136_v41 }
 0x5ab   :  { %2602 = vmatprep.subr.bf16.mxu0 %v3138_v42  ;;  %2634 = vmatprep.subr.bf16.mxu1 %v3141_v49 }
 0x5ae   :  { %2604 = vmatpush1.bf16.msra.mxu0 %v3144_v53  ;;  %2636 = vmatpush1.bf16.msra.mxu1 %v3148_v54 }
 0x5af   :  { %2638 = vmatprep.subr.bf16.mxu0 %v3046_v10  ;;  %2670 = vmatprep.subr.bf16.mxu1 %v3050_v14 }
 0x664   :  { %v1378_v50 = vpop.f32.mrb[12].mxu0  ;;  %v1449_v4 = vpop.f32.mrb[12].mxu1 }
 0x665   :  { %v1458_v5 = vrot.slane %v1378_v50, 3  ;;  %v1380_v9 = vpop.f32.mrb[13].mxu0  ;;  %v1451_v15 = vpop.f32.mrb[13].mxu1  ;;  %v1460_v10 = vrot.slane %v1449_v4, 3 }
 0x666   :  { %v1459_v16 = vrot.slane %v1380_v9, 3  ;;  %v1461_v29 = vrot.slane %v1451_v15, 3 }
 0x667   :  { %v1466_v17 = vadd.f32 %v1458_v5, %v3194_v11  ;;  %v1468_v14 = vadd.f32 %v1460_v10, %v3203_v44  ;;  %v1886_v10 = vld [vmem:[%s3544_s4 + $0x20] sm:$0xff] }
 0x668   :  { %v1467_v19 = vadd.f32 %v1459_v16, %v3196_v12  ;;  %v1469_v57 = vadd.f32 %v1461_v29, %v3200_v36  ;;  %v1882_v16 = vld [vmem:[%s3544_s4] sm:$0xff]  ;;  %v1885_v29 = vld [vmem:[%s3544_s4 + $0x18] sm:$0xff] }
 0x669   :  { %v2035_v26 = vmul.f32 -1.442695, %v1466_v17  ;;  %v1883_v17 = vld [vmem:[%s3544_s4 + $0x8] sm:$0xff] }
 0x66a   :  { %v2036_v28 = vmul.f32 -1.442695, %v1467_v19  ;;  %v2037_v32 = vmul.f32 -1.442695, %v1469_v57  ;;  %v2702_v19 = vpack.c.bf16 %v1883_v17, %v1882_v16 }
 0x66b   :  { %2816 = vpow2.f32 %v2035_v26  ;;  %v2966_v26 = vmov 0.0|0.0  }
 0x66c   :  { %2818 = vpow2.f32 %v2036_v28  ;;  %v1884_v28 = vld [vmem:[%s3544_s4 + $0x10] sm:$0xff] }
 0x66d   :  { %2820 = vpow2.f32 %v2037_v32  ;;  %v2705_v57 = vpack.c.bf16 %v1885_v29, %v1884_v28  ;;  %v1887_v32 = vld [vmem:[%s3544_s4 + $0x28] sm:$0xff] }
 0x66e   :  { %2822 = vtanh.f32 %v1468_v14  ;;  %v2708_v14 = vpack.c.bf16 %v1887_v32, %v1886_v10 }
 0x675   :  { %v2817_v37 = vpop.eup %2816 }
 0x676   :  { %v2819_v38 = vpop.eup %2818  ;;  %v1473_v45 = vadd.f32 1.0, %v2817_v37  ;;  %v1888_v37 = vld [vmem:[%s3544_s4 + $0x30] sm:$0xff] }
 0x677   :  { %v1479_v18 = vadd.f32 1.0, %v2819_v38  ;;  %v2821_v51 = vpop.eup %2820  ;;  %v1889_v38 = vld [vmem:[%s3544_s4 + $0x38] sm:$0xff] }
 0x678   :  { %2824 = vrcp.f32 %v1473_v45  ;;  %v2823_v55 = vpop.eup %2822  ;;  %v1486_v1 = vadd.f32 1.0, %v2821_v51  ;;  %v2711_v45 = vpack.c.bf16 %v1889_v38, %v1888_v37  ;;  %v1891_v51 = vld [vmem:[%s3544_s4 + $0x48] sm:$0xff] }
 0x679   :  { %2826 = vrcp.f32 %v1479_v18  ;;  %v1890_v18 = vld [vmem:[%s3544_s4 + $0x40] sm:$0xff] }
 0x67a   :  { %2828 = vrcp.f32 %v1486_v1 }
 0x682   :  { %v2825_v56 = vpop.eup %2824 }
 0x683   :  { %v2827_v31 = vpop.eup %2826  ;;  %v1493_v61 = vmul.f32 %v2825_v56, %v2823_v55  ;;  %v2714_v55 = vpack.c.bf16 %v1891_v51, %v1890_v18  ;;  %v1892_v56 = vld [vmem:[%s3544_s4 + $0x50] sm:$0xff] }
 0x684   :  { %v1492_v3 = vmul.f32 %v2827_v31, %v1490_v62  ;;  %v2829_v50 = vpop.eup %2828  ;;  %v1894_v31 = vld [vmem:[%s3544_s4 + $0x60] sm:$0xff] }
 0x686   :  { %v3416_v2 = vadd.f32 %v1493_v61, %v1492_v3  ;;  %v1895_v61 = vld [vmem:[%s3544_s4 + $0x68] sm:$0xff]  ;;  %v1896_v3 = vld [vmem:[%s3544_s4 + $0x70] sm:$0xff] }
 0x687   :  { %v2720_v1 = vpack.c.bf16 %v1895_v61, %v1894_v31 }
 0x688   :  { %2830 = vtanh.f32 %v3416_v2 }
 0x692   :  { %v2831_v4 = vpop.eup %2830 }
 0x693   :  { %v1496_v5 = vmul.f32 %v2831_v4, %v2829_v50 }
 0x695   :  { %v1498_v9 = vrot.slane %v1496_v5, 5 }
 0x697   :  { %1565 = vmatmul.mubr.f32.vlgmr.msra.gmra.mrb[14].mxu0 %v1498_v9  ;;  %1636 = vmatmul.mubr.f32.vlgmr.msra.gmra.mrb[14].mxu1 %v1498_v9 }
 0x698   :  { %2640 = vmatpush1.bf16.msra.mxu0 %v3057_v21  ;;  %2672 = vmatpush1.bf16.msra.mxu1 %v3062_v22 }
 0x699   :  { %2642 = vmatprep.subr.bf16.mxu0 %v3064_v23  ;;  %2674 = vmatprep.subr.bf16.mxu1 %v3067_v27 }
 0x69a   :  { %1752 = vmatprep.mubr.f32.mxu0 %v2965_v43  ;;  %1823 = vmatprep.mubr.f32.mxu1 %v2965_v43 }
 0x69c   :  { %2644 = vmatpush1.bf16.msra.mxu0 %v3070_v33  ;;  %2676 = vmatpush1.bf16.msra.mxu1 %v3074_v34 }
 0x69d   :  { %2646 = vmatprep.subr.bf16.mxu0 %v3076_v35  ;;  %2678 = vmatprep.subr.bf16.mxu1 %v3079_v39 }
 0x6a0   :  { %2648 = vmatpush1.bf16.msra.mxu0 %v3084_v46  ;;  %2680 = vmatpush1.bf16.msra.mxu1 %v3088_v47 }
 0x6a1   :  { %2650 = vmatprep.subr.bf16.mxu0 %v3090_v48  ;;  %2682 = vmatprep.subr.bf16.mxu1 %v3093_v52 }
 0x6a4   :  { %2652 = vmatpush1.bf16.msra.mxu0 %v3096_v58  ;;  %2684 = vmatpush1.bf16.msra.mxu1 %v3100_v59 }
 0x6a5   :  { %2654 = vmatprep.subr.bf16.mxu0 %v3102_v60  ;;  %2686 = vmatprep.subr.bf16.mxu1 %v3105_v0 }
 0x6a8   :  { %2656 = vmatpush1.bf16.msra.mxu0 %v3108_v6  ;;  %2688 = vmatpush1.bf16.msra.mxu1 %v3112_v7 }
 0x6a9   :  { %2658 = vmatprep.subr.bf16.mxu0 %v3114_v8  ;;  %2690 = vmatprep.subr.bf16.mxu1 %v3117_v13 }
 0x6ac   :  { %2660 = vmatpush1.bf16.msra.mxu0 %v3120_v20  ;;  %2692 = vmatpush1.bf16.msra.mxu1 %v3124_v24 }
 0x6ad   :  { %2662 = vmatprep.subr.bf16.mxu0 %v3126_v25  ;;  %2694 = vmatprep.subr.bf16.mxu1 %v3129_v30  ;;  %v1678_v25 = vrot.slane %v3416_v2, 7  ;;  %v1897_v2 = vld [vmem:[%s3544_s4 + $0x78] sm:$0xff] }
 0x6ae   :  { %v2723_v50 = vpack.c.bf16 %v1897_v2, %v1896_v3 }
 0x6b0   :  { %2664 = vmatpush1.bf16.msra.mxu0 %v3132_v40  ;;  %2696 = vmatpush1.bf16.msra.mxu1 %v3136_v41 }
 0x6b1   :  { %2666 = vmatprep.subr.bf16.mxu0 %v3138_v42  ;;  %2698 = vmatprep.subr.bf16.mxu1 %v3141_v49 }
 0x6b4   :  { %2668 = vmatpush1.bf16.msra.mxu0 %v3144_v53  ;;  %2700 = vmatpush1.bf16.msra.mxu1 %v3148_v54 }
 0x6b5   :  { %2701 = vmatprep.subr.bf16.mxu0 %v2966_v26 }
 0x76a   :  { %v1566_v21 = vpop.f32.mrb[14].mxu0  ;;  %v1637_v22 = vpop.f32.mrb[14].mxu1 }
 0x76b   :  { %v1646_v23 = vrot.slane %v1566_v21, 2  ;;  %v1568_v27 = vpop.f32.mrb[15].mxu0  ;;  %v1639_v33 = vpop.f32.mrb[15].mxu1  ;;  %v1648_v58 = vrot.slane %v1637_v22, 2 }
 0x76c   :  { %v1647_v34 = vrot.slane %v1568_v27, 2  ;;  %v1649_v48 = vrot.slane %v1639_v33, 2 }
 0x76d   :  { %v1654_v35 = vadd.f32 %v1646_v23, %v3194_v11  ;;  %v1656_v60 = vadd.f32 %v1648_v58, %v3203_v44 }
 0x76e   :  { %v1655_v39 = vadd.f32 %v1647_v34, %v3196_v12  ;;  %v1657_v52 = vadd.f32 %v1649_v48, %v3200_v36 }
 0x76f   :  { %v2038_v46 = vmul.f32 -1.442695, %v1654_v35 }
 0x770   :  { %v2039_v47 = vmul.f32 -1.442695, %v1655_v39  ;;  %v2040_v59 = vmul.f32 -1.442695, %v1657_v52 }
 0x771   :  { %2832 = vpow2.f32 %v2038_v46 }
 0x772   :  { %2834 = vpow2.f32 %v2039_v47 }
 0x773   :  { %2836 = vpow2.f32 %v2040_v59 }
 0x774   :  { %2838 = vtanh.f32 %v1656_v60 }
 0x77b   :  { %v2833_v0 = vpop.eup %2832 }
 0x77c   :  { %v2835_v6 = vpop.eup %2834  ;;  %v1661_v7 = vadd.f32 1.0, %v2833_v0 }
 0x77d   :  { %v1667_v8 = vadd.f32 1.0, %v2835_v6  ;;  %v2837_v13 = vpop.eup %2836 }
 0x77e   :  { %2840 = vrcp.f32 %v1661_v7  ;;  %v2839_v20 = vpop.eup %2838  ;;  %v1674_v41 = vadd.f32 1.0, %v2837_v13 }
 0x77f   :  { %2842 = vrcp.f32 %v1667_v8 }
 0x780   :  { %2844 = vrcp.f32 %v1674_v41 }
 0x788   :  { %v2841_v24 = vpop.eup %2840 }
 0x789   :  { %v2843_v30 = vpop.eup %2842  ;;  %v1681_v40 = vmul.f32 %v2841_v24, %v2839_v20 }
 0x78a   :  { %v1680_v42 = vmul.f32 %v2843_v30, %v1678_v25  ;;  %v2845_v53 = vpop.eup %2844 }
 0x78c   :  { %v3456_v49 = vadd.f32 %v1681_v40, %v1680_v42 }
 0x78e   :  { %2846 = vtanh.f32 %v3456_v49  ;;  %v1866_v7 = vrot.slane %v3456_v49, 7  ;;  %v2044_v49 = vld [vmem:[%s3545_s5] ss:$0 sm:$0xff] }
 0x798   :  { %v2847_v54 = vpop.eup %2846 }
 0x799   :  { %v1684_v63 = vmul.f32 %v2847_v54, %v2845_v53 }
 0x79b   :  { %v1686_v15 = vrot.slane %v1684_v63, 6 }
 0x79d   :  { %1753 = vmatmul.mubr.f32.vlgmr.msra.gmra.mrb[16].mxu0 %v1686_v15  ;;  %1824 = vmatmul.mubr.f32.vlgmr.msra.gmra.mrb[16].mxu1 %v1686_v15 }
 0x79e   :  { %2703 = vmatpush3.bf16.msra.mxu0 %v2702_v19  ;;  %2094 = vmatprep.mubr.msk.f32.mxu0 %vm2967_vm4, %v2965_v43  ;;  %v1893_v43 = vld [vmem:[%s3544_s4 + $0x58] sm:$0xff] }
 0x79f   :  { %2704 = vmatprep.subr.bf16.mxu0 %v2966_v26  ;;  %v2717_v62 = vpack.c.bf16 %v1893_v43, %v1892_v56 }
 0x7a2   :  { %2706 = vmatpush3.bf16.msra.mxu0 %v2705_v57 }
 0x7a3   :  { %2707 = vmatprep.subr.bf16.mxu0 %v2966_v26 }
 0x7a6   :  { %2709 = vmatpush3.bf16.msra.mxu0 %v2708_v14 }
 0x7a7   :  { %2710 = vmatprep.subr.bf16.mxu0 %v2966_v26 }
 0x7aa   :  { %2712 = vmatpush3.bf16.msra.mxu0 %v2711_v45 }
 0x7ab   :  { %2713 = vmatprep.subr.bf16.mxu0 %v2966_v26 }
 0x7ae   :  { %2715 = vmatpush3.bf16.msra.mxu0 %v2714_v55 }
 0x7af   :  { %2716 = vmatprep.subr.bf16.mxu0 %v2966_v26 }
 0x7b2   :  { %2718 = vmatpush3.bf16.msra.mxu0 %v2717_v62 }
 0x7b3   :  { %2719 = vmatprep.subr.bf16.mxu0 %v2966_v26 }
 0x7b6   :  { %2721 = vmatpush3.bf16.msra.mxu0 %v2720_v1 }
 0x7b7   :  { %2722 = vmatprep.subr.bf16.mxu0 %v2966_v26 }
 0x7ba   :  { %2724 = vmatpush3.bf16.msra.mxu0 %v2723_v50 }
 0x870   :  { %v1754_v4 = vpop.f32.mrb[16].mxu0  ;;  %v1825_v5 = vpop.f32.mrb[16].mxu1 }
 0x871   :  { %v1834_v9 = vrot.slane %v1754_v4, 1  ;;  %v1756_v21 = vpop.f32.mrb[17].mxu0  ;;  %v1827_v22 = vpop.f32.mrb[17].mxu1  ;;  %v1836_v47 = vrot.slane %v1825_v5, 1 }
 0x872   :  { %v1835_v23 = vrot.slane %v1756_v21, 1  ;;  %v1837_v39 = vrot.slane %v1827_v22, 1 }
 0x873   :  { %v1842_v27 = vadd.f32 %v1834_v9, %v3194_v11  ;;  %v1844_v52 = vadd.f32 %v1836_v47, %v3203_v44 }
 0x874   :  { %v1843_v33 = vadd.f32 %v1835_v23, %v3196_v12  ;;  %v1845_v46 = vadd.f32 %v1837_v39, %v3200_v36 }
 0x875   :  { %v2041_v34 = vmul.f32 -1.442695, %v1842_v27 }
 0x876   :  { %v2042_v35 = vmul.f32 -1.442695, %v1843_v33  ;;  %v2043_v48 = vmul.f32 -1.442695, %v1845_v46 }
 0x877   :  { %2848 = vpow2.f32 %v2041_v34 }
 0x878   :  { %2850 = vpow2.f32 %v2042_v35 }
 0x879   :  { %2852 = vpow2.f32 %v2043_v48 }
 0x87a   :  { %2854 = vtanh.f32 %v1844_v52 }
 0x881   :  { %v2849_v58 = vpop.eup %2848 }
 0x882   :  { %v2851_v59 = vpop.eup %2850  ;;  %v1849_v60 = vadd.f32 1.0, %v2849_v58 }
 0x883   :  { %v1855_v0 = vadd.f32 1.0, %v2851_v59  ;;  %v2853_v11 = vpop.eup %2852 }
 0x884   :  { %2856 = vrcp.f32 %v1849_v60  ;;  %v2855_v12 = vpop.eup %2854  ;;  %v1862_v36 = vadd.f32 1.0, %v2853_v11 }
 0x885   :  { %2858 = vrcp.f32 %v1855_v0 }
 0x886   :  { %2860 = vrcp.f32 %v1862_v36 }
 0x88e   :  { %v2857_v6 = vpop.eup %2856 }
 0x88f   :  { %v2859_v8 = vpop.eup %2858  ;;  %v1869_v13 = vmul.f32 %v2857_v6, %v2855_v12 }
 0x890   :  { %v1868_v20 = vmul.f32 %v2859_v8, %v1866_v7  ;;  %v2861_v44 = vpop.eup %2860 }
 0x892   :  { %v1870_v24 = vadd.f32 %v1869_v13, %v1868_v20 }
 0x894   :  { %2862 = vtanh.f32 %v1870_v24  ;;  %v1877_v41 = vrot.slane %v1870_v24, 6 }
 0x89e   :  { %v2863_v25 = vpop.eup %2862 }
 0x89f   :  { %v1872_v30 = vmul.f32 %v2863_v25, %v2861_v44 }
 0x8a1   :  { %v1874_v40 = vrot.slane %v1872_v30, 7 }
 0x8a3   :  { %v1880_v42 = vsel %vm1879_vm5, %v1874_v40, %v1877_v41 }
 0x8a4   :  { %v1881_v53 = vmax.f32 %v1880_v42, 0.0 }
 0x8a6   :  { %2095 = vmatmul.mubr.f32.vlgmr.msra.gmra.mrb[18].mxu0 %v1881_v53 }
 0x979   :  { %v1971_v54 = vpop.f32.mrb[18].mxu0 }
 0x97a   :  { %v1972_v63 = vadd.f32 %v2044_v49, %v1971_v54  ;;  %v2096_v15 = vpop.f32.mrb[19].mxu0 }
 0x97c   :  { %v1978_v16 = vrot.slane %v1972_v63, 7  ;;  %1976 = vst.msk [vmem:[#allocation7] sm:$0x3] %vm1975_vm6, %v1972_v63 }
 0x97d   :  { %2919 = shalt.err (!%p2916_p6)
}
 0x97e   :  { %s2920_s18 = scalar_lea.hbm %s3546_s6, 32 }
 0x97f   :  { %p2921_p7 = scmp.ne.s32.totalorder %s3546_s6, %s2920_s18  ;;  %p2924_p8 = scmp.lt.u32.totalorder %s2920_s18, %s3546_s6 }
 0x981   :  { %p2926_p9 = pnand %p2924_p8, %p2921_p7 }
 0x983   :  { %2929 = shalt.err (!%p2926_p9)
}
 0x984   :  { %1993 = dma.vmem_to_hbm [thread:$0]  %s1991_s13, 32, %s3546_s6, [#allocation4]   ;;  %vm1982_vm7 = vcmask 17409   ;;  %vm1980_vm8 = vcmp.gt.f32.partialorder %v1972_v63, %v1978_v16  ;;  %v2970_v17 = vmov 0  }
 0x985   :  { %v1981_v19 = vsel %vm1980_vm8, 1, %v2970_v17  ;;  %s2930_s1 = scalar_lea.vmem %s2001_s15, 16  ;;  %s2934_s25 = scalar_lea.vmem %s2001_s15, 32 }
 0x986   :  { %1983 = vst.msk [vmem:[#allocation8 - $0x1] sm:$0x2] %vm1982_vm7, %v1981_v19  ;;  %p2931_p10 = scmp.ne.s32.totalorder %s2001_s15, %s2930_s1  ;;  %p2935_p11 = scmp.lt.s32.totalorder %s2001_s15, %s2001_s15 }
 0x987   :  { %p2936_p12 = scmp.lt.s32.totalorder %s2934_s25, %s2930_s1 }
 0x989   :  { %p2937_p13 = por %p2936_p12, %p2935_p11 }
 0x98b   :  { %p2938_p0 = pnand %p2937_p13, %p2931_p10 }
 0x98d   :  { %2941 = shalt.err (!%p2938_p0)
}
 0x98e   :  { %s2942_s27 = scalar_lea.hbm %s3547_s7, 16 }
 0x98f   :  { %p2943_p1 = scmp.ne.s32.totalorder %s3547_s7, %s2942_s27  ;;  %p2946_p2 = scmp.lt.u32.totalorder %s2942_s27, %s3547_s7 }
 0x991   :  { %p2948_p3 = pnand %p2946_p2, %p2943_p1 }
 0x993   :  { %2951 = shalt.err (!%p2948_p3)
}
 0x994   :  { %2003 = dma.vmem_to_hbm [thread:$0]  %s2001_s15, 16, %s3547_s7, [#allocation9]  }
 0x995   :  { %2956 = dma.done.wait [#allocation4], 32  }
 0x996   :  { %2957 = vsyncadd [#allocation4], 4294967264 }
 0x997   :  { %2958 = dma.done.wait [#allocation9], 16  }
 0x998   :  { %2959 = vsyncadd [#allocation9], 4294967280 }
 0x999   :  { %2010 = vsyncpa [#allocation3], 1 }
 0x99a   :  { %2011 = vsyncpa [#allocation6], 1 }
 0x99b   :  { %2012 = vsyncpa [#allocation4], 1 }
 0x99c   :  { %2013 = vsyncpa [#allocation9], 1 }

</bundles_post_ra>
